<compile_context>
chip_gen: v6e
topology: v6e:2x2x1
jax: 0.10.0
libtpu: 0.0.40
codegen_flags: <defaults>
</compile_context>

<pallas_src>
import functools

import jax
import jax.numpy as jnp
from jax.experimental import pallas as pl
from jax.experimental.pallas import tpu as pltpu

EPS = 1e-5          # nn.InstanceNorm2d default
NEG_SLOPE = 0.2     # LeakyReLU slope
KH = KW = 4         # fixed 4x4 kernel of the Block module
PAD = 1             # fixed padding of the Block module


def _make_block_kernel(stride, Ho, Wo, C_in, C_out, mxu_dtype):
    P = Ho * Wo
    inv_p = 1.0 / P

    def kernel(xw_ref, w_ref, o_ref):
        # xw_ref: (1, s, Hq, s, Wq, C_in)  stride-phase-decomposed padded input
        # w_ref : (KH*KW, C_in, C_out)     tap-major conv weights (grid-resident)
        # o_ref : (1, C_out, P)            lane-dense output, P = Ho*Wo
        acc = jnp.zeros((P, C_out), jnp.float32)
        # Convolution as a sum over the 16 taps; every slice below is contiguous
        # (the stride was folded into the phase dims in the wrapper).
        for i in range(KH):
            for j in range(KW):
                tap = xw_ref[0, i % stride, pl.ds(i // stride, Ho),
                             j % stride, pl.ds(j // stride, Wo), :]   # (Ho, Wo, C_in)
                tap2d = tap.reshape(P, C_in)
                w_tap = w_ref[i * KW + j]                             # (C_in, C_out)
                if mxu_dtype is not None:
                    tap2d = tap2d.astype(mxu_dtype)
                    w_tap = w_tap.astype(mxu_dtype)
                acc = acc + jnp.dot(tap2d, w_tap,
                                    preferred_element_type=jnp.float32)
        # NOTE: conv bias intentionally omitted — it is cancelled exactly by the
        # mean subtraction of the non-affine InstanceNorm below.

        # InstanceNorm2d (no affine): single-pass per-channel stats over P.
        s1 = jnp.sum(acc, axis=0, keepdims=True)            # (1, C_out)
        s2 = jnp.sum(acc * acc, axis=0, keepdims=True)      # (1, C_out)
        mean = s1 * inv_p
        var = jnp.maximum(s2 * inv_p - mean * mean, 0.0)    # biased variance
        y = (acc - mean) * jax.lax.rsqrt(var + EPS)
        # LeakyReLU(0.2)
        y = jnp.where(y >= 0, y, NEG_SLOPE * y)
        # Lane-dense store: last dim is P (large multiple of 128 at real sizes).
        o_ref[0] = y.T.astype(o_ref.dtype)

    return kernel


@functools.partial(jax.jit, static_argnums=(3,), static_argnames=("mxu_dtype",))
def block_forward(x, weight, bias, stride, mxu_dtype=None):
    # x: [B, C_in, H, W] (NCHW); weight: [C_out, C_in, 4, 4]; bias: [C_out]
    del bias  # mathematically a no-op through the non-affine InstanceNorm
    B, C_in, H, W = x.shape
    C_out = weight.shape[0]
    s = int(stride)

    # NCHW -> NHWC, reflect pad by 1 (matches padding_mode='reflect').
    xp = jnp.pad(jnp.transpose(x, (0, 2, 3, 1)),
                 ((0, 0), (PAD, PAD), (PAD, PAD), (0, 0)), mode="reflect")
    Hp, Wp = H + 2 * PAD, W + 2 * PAD
    Ho = (Hp - KH) // s + 1
    Wo = (Wp - KW) // s + 1
    P = Ho * Wo

    # Stride-phase decomposition: [B, Hp, Wp, C] -> [B, s, Hq, s, Wq, C] so that
    # row ho*s+i lives at [i%s, ho + i//s] and all in-kernel slices are
    # contiguous.  Pure reshape/transpose — no data amplification.
    Hq = -(-Hp // s)
    Wq = -(-Wp // s)
    xp = jnp.pad(xp, ((0, 0), (0, Hq * s - Hp), (0, Wq * s - Wp), (0, 0)))
    xw = xp.reshape(B, Hq, s, Wq, s, C_in).transpose(0, 2, 1, 4, 3, 5)

    # Weight as (tap, C_in, C_out): w_taps[i*KW+j, ci, co] = weight[co, ci, i, j].
    w_taps = jnp.transpose(weight, (2, 3, 1, 0)).reshape(KH * KW, C_in, C_out)

    kernel = _make_block_kernel(s, Ho, Wo, C_in, C_out, mxu_dtype)
    out = pl.pallas_call(
        kernel,
        out_shape=jax.ShapeDtypeStruct((B, C_out, P), x.dtype),
        grid_spec=pltpu.PrefetchScalarGridSpec(
            num_scalar_prefetch=0,
            grid=(B,),
            in_specs=[
                pl.BlockSpec((1, s, Hq, s, Wq, C_in),
                             lambda b: (b, 0, 0, 0, 0, 0)),
                # Weight index_map is constant -> stays resident across the grid.
                pl.BlockSpec((KH * KW, C_in, C_out), lambda b: (0, 0, 0)),
            ],
            out_specs=pl.BlockSpec((1, C_out, P), lambda b: (b, 0, 0)),
        ),
        compiler_params=pltpu.CompilerParams(
            dimension_semantics=("parallel",)),
    )(xw, w_taps)

    # [B, C_out, P] -> [B, C_out, Ho, Wo]: pure reshape, no HBM transpose needed.
    return out.reshape(B, C_out, Ho, Wo)


def _reference(x, weight, bias, stride):
    # Pure-JAX reference (includes the bias, proving it cancels through the norm).
    xp = jnp.pad(x, ((0, 0), (0, 0), (1, 1), (1, 1)), mode="reflect")
    y = jax.lax.conv_general_dilated(
        xp, weight, window_strides=(stride, stride), padding="VALID",
        dimension_numbers=("NCHW", "OIHW", "NCHW"))
    y = y + bias.reshape(1, -1, 1, 1)
    mean = jnp.mean(y, axis=(2, 3), keepdims=True)
    var = jnp.mean((y - mean) ** 2, axis=(2, 3), keepdims=True)
    y = (y - mean) / jnp.sqrt(var + EPS)
    return jnp.where(y >= 0, y, NEG_SLOPE * y)


if __name__ == "__main__":
    key = jax.random.PRNGKey(0)
    B, C_in, H, W = 2, 4, 16, 16
    C_out, stride = 8, 2

    kx, kw_, kb = jax.random.split(key, 3)
    x = jax.random.normal(kx, (B, C_in, H, W), dtype=jnp.float32)
    # Deterministic, torch-conv-like init (uniform in +-1/sqrt(fan_in)).
    fan_in = C_in * KH * KW
    bound = 1.0 / (fan_in ** 0.5)
    weight = jax.random.uniform(kw_, (C_out, C_in, KH, KW), jnp.float32, -bound, bound)
    bias = jax.random.uniform(kb, (C_out,), jnp.float32, -bound, bound)

    out = jax.block_until_ready(block_forward(x, weight, bias, stride))
    ref = _reference(x, weight, bias, stride)
    assert out.shape == (B, C_out, 8, 8), out.shape
    assert jnp.allclose(out, ref, rtol=2e-4, atol=2e-4), \
        float(jnp.max(jnp.abs(out - ref)))
    print("KERNEL_OK")
</pallas_src>

<mosaic_0001>
module attributes {stable_mosaic.version = 11 : i64} {
  func.func @kernel(%arg0: i32, %arg1: memref<1x2x9x2x9x4xf32, #tpu.memory_space<vmem>>, %arg2: memref<16x4x8xf32, #tpu.memory_space<vmem>>, %arg3: memref<1x8x64xf32, #tpu.memory_space<vmem>>) attributes {dimension_semantics = [#tpu.dimension_semantics<parallel>], iteration_bounds = array<i64: 2>, scalar_prefetch = 0 : i64, scratch_operands = 0 : i64, tpu.core_type = #tpu.core_type<tc>, window_params = [{transform_indices = @transform_0, window_bounds = array<i64: 1, 2, 9, 2, 9, 4>}, {pipeline_mode = #tpu.pipeline_mode<synchronous>, transform_indices = @transform_1, window_bounds = array<i64: 16, 4, 8>}, {transform_indices = @transform_2, window_bounds = array<i64: 1, 8, 64>}]} {
    %cst = arith.constant 0.000000e+00 : f32
    %0 = vector.broadcast %cst : f32 to vector<64x8xf32>
    %c0 = arith.constant 0 : index
    %c0_0 = arith.constant 0 : index
    %c0_1 = arith.constant 0 : index
    %c0_2 = arith.constant 0 : index
    %c0_3 = arith.constant 0 : index
    %c0_4 = arith.constant 0 : index
    %1 = vector.load %arg1[%c0, %c0_0, %c0_1, %c0_2, %c0_3, %c0_4] : memref<1x2x9x2x9x4xf32, #tpu.memory_space<vmem>>, vector<1x1x8x1x8x4xf32>
    %2 = vector.shape_cast %1 : vector<1x1x8x1x8x4xf32> to vector<8x8x4xf32>
    %3 = vector.shape_cast %2 : vector<8x8x4xf32> to vector<64x4xf32>
    %c0_5 = arith.constant 0 : index
    %c0_6 = arith.constant 0 : index
    %c0_7 = arith.constant 0 : index
    %4 = vector.load %arg2[%c0_5, %c0_6, %c0_7] : memref<16x4x8xf32, #tpu.memory_space<vmem>>, vector<1x4x8xf32>
    %5 = vector.shape_cast %4 : vector<1x4x8xf32> to vector<4x8xf32>
    %cst_8 = arith.constant dense<0.000000e+00> : vector<64x8xf32>
    %6 = tpu.matmul %3, %5, %cst_8 {dimension_numbers = #tpu.dot_dimension_numbers<[1], [0], [0], [1], [0, 0, 1, 1], [], []>} : vector<64x4xf32>, vector<4x8xf32>, vector<64x8xf32> -> vector<64x8xf32>
    %7 = arith.addf %0, %6 : vector<64x8xf32>
    %c0_9 = arith.constant 0 : index
    %c0_10 = arith.constant 0 : index
    %c0_11 = arith.constant 0 : index
    %c1 = arith.constant 1 : index
    %c0_12 = arith.constant 0 : index
    %c0_13 = arith.constant 0 : index
    %8 = vector.load %arg1[%c0_9, %c0_10, %c0_11, %c1, %c0_12, %c0_13] : memref<1x2x9x2x9x4xf32, #tpu.memory_space<vmem>>, vector<1x1x8x1x8x4xf32>
    %9 = vector.shape_cast %8 : vector<1x1x8x1x8x4xf32> to vector<8x8x4xf32>
    %10 = vector.shape_cast %9 : vector<8x8x4xf32> to vector<64x4xf32>
    %c1_14 = arith.constant 1 : index
    %c0_15 = arith.constant 0 : index
    %c0_16 = arith.constant 0 : index
    %11 = vector.load %arg2[%c1_14, %c0_15, %c0_16] : memref<16x4x8xf32, #tpu.memory_space<vmem>>, vector<1x4x8xf32>
    %12 = vector.shape_cast %11 : vector<1x4x8xf32> to vector<4x8xf32>
    %cst_17 = arith.constant dense<0.000000e+00> : vector<64x8xf32>
    %13 = tpu.matmul %10, %12, %cst_17 {dimension_numbers = #tpu.dot_dimension_numbers<[1], [0], [0], [1], [0, 0, 1, 1], [], []>} : vector<64x4xf32>, vector<4x8xf32>, vector<64x8xf32> -> vector<64x8xf32>
    %14 = arith.addf %7, %13 : vector<64x8xf32>
    %c0_18 = arith.constant 0 : index
    %c0_19 = arith.constant 0 : index
    %c0_20 = arith.constant 0 : index
    %c0_21 = arith.constant 0 : index
    %c1_22 = arith.constant 1 : index
    %c0_23 = arith.constant 0 : index
    %15 = vector.load %arg1[%c0_18, %c0_19, %c0_20, %c0_21, %c1_22, %c0_23] : memref<1x2x9x2x9x4xf32, #tpu.memory_space<vmem>>, vector<1x1x8x1x8x4xf32>
    %16 = vector.shape_cast %15 : vector<1x1x8x1x8x4xf32> to vector<8x8x4xf32>
    %17 = vector.shape_cast %16 : vector<8x8x4xf32> to vector<64x4xf32>
    %c2 = arith.constant 2 : index
    %c0_24 = arith.constant 0 : index
    %c0_25 = arith.constant 0 : index
    %18 = vector.load %arg2[%c2, %c0_24, %c0_25] : memref<16x4x8xf32, #tpu.memory_space<vmem>>, vector<1x4x8xf32>
    %19 = vector.shape_cast %18 : vector<1x4x8xf32> to vector<4x8xf32>
    %cst_26 = arith.constant dense<0.000000e+00> : vector<64x8xf32>
    %20 = tpu.matmul %17, %19, %cst_26 {dimension_numbers = #tpu.dot_dimension_numbers<[1], [0], [0], [1], [0, 0, 1, 1], [], []>} : vector<64x4xf32>, vector<4x8xf32>, vector<64x8xf32> -> vector<64x8xf32>
    %21 = arith.addf %14, %20 : vector<64x8xf32>
    %c0_27 = arith.constant 0 : index
    %c0_28 = arith.constant 0 : index
    %c0_29 = arith.constant 0 : index
    %c1_30 = arith.constant 1 : index
    %c1_31 = arith.constant 1 : index
    %c0_32 = arith.constant 0 : index
    %22 = vector.load %arg1[%c0_27, %c0_28, %c0_29, %c1_30, %c1_31, %c0_32] : memref<1x2x9x2x9x4xf32, #tpu.memory_space<vmem>>, vector<1x1x8x1x8x4xf32>
    %23 = vector.shape_cast %22 : vector<1x1x8x1x8x4xf32> to vector<8x8x4xf32>
    %24 = vector.shape_cast %23 : vector<8x8x4xf32> to vector<64x4xf32>
    %c3 = arith.constant 3 : index
    %c0_33 = arith.constant 0 : index
    %c0_34 = arith.constant 0 : index
    %25 = vector.load %arg2[%c3, %c0_33, %c0_34] : memref<16x4x8xf32, #tpu.memory_space<vmem>>, vector<1x4x8xf32>
    %26 = vector.shape_cast %25 : vector<1x4x8xf32> to vector<4x8xf32>
    %cst_35 = arith.constant dense<0.000000e+00> : vector<64x8xf32>
    %27 = tpu.matmul %24, %26, %cst_35 {dimension_numbers = #tpu.dot_dimension_numbers<[1], [0], [0], [1], [0, 0, 1, 1], [], []>} : vector<64x4xf32>, vector<4x8xf32>, vector<64x8xf32> -> vector<64x8xf32>
    %28 = arith.addf %21, %27 : vector<64x8xf32>
    %c0_36 = arith.constant 0 : index
    %c1_37 = arith.constant 1 : index
    %c0_38 = arith.constant 0 : index
    %c0_39 = arith.constant 0 : index
    %c0_40 = arith.constant 0 : index
    %c0_41 = arith.constant 0 : index
    %29 = vector.load %arg1[%c0_36, %c1_37, %c0_38, %c0_39, %c0_40, %c0_41] : memref<1x2x9x2x9x4xf32, #tpu.memory_space<vmem>>, vector<1x1x8x1x8x4xf32>
    %30 = vector.shape_cast %29 : vector<1x1x8x1x8x4xf32> to vector<8x8x4xf32>
    %31 = vector.shape_cast %30 : vector<8x8x4xf32> to vector<64x4xf32>
    %c4 = arith.constant 4 : index
    %c0_42 = arith.constant 0 : index
    %c0_43 = arith.constant 0 : index
    %32 = vector.load %arg2[%c4, %c0_42, %c0_43] : memref<16x4x8xf32, #tpu.memory_space<vmem>>, vector<1x4x8xf32>
    %33 = vector.shape_cast %32 : vector<1x4x8xf32> to vector<4x8xf32>
    %cst_44 = arith.constant dense<0.000000e+00> : vector<64x8xf32>
    %34 = tpu.matmul %31, %33, %cst_44 {dimension_numbers = #tpu.dot_dimension_numbers<[1], [0], [0], [1], [0, 0, 1, 1], [], []>} : vector<64x4xf32>, vector<4x8xf32>, vector<64x8xf32> -> vector<64x8xf32>
    %35 = arith.addf %28, %34 : vector<64x8xf32>
    %c0_45 = arith.constant 0 : index
    %c1_46 = arith.constant 1 : index
    %c0_47 = arith.constant 0 : index
    %c1_48 = arith.constant 1 : index
    %c0_49 = arith.constant 0 : index
    %c0_50 = arith.constant 0 : index
    %36 = vector.load %arg1[%c0_45, %c1_46, %c0_47, %c1_48, %c0_49, %c0_50] : memref<1x2x9x2x9x4xf32, #tpu.memory_space<vmem>>, vector<1x1x8x1x8x4xf32>
    %37 = vector.shape_cast %36 : vector<1x1x8x1x8x4xf32> to vector<8x8x4xf32>
    %38 = vector.shape_cast %37 : vector<8x8x4xf32> to vector<64x4xf32>
    %c5 = arith.constant 5 : index
    %c0_51 = arith.constant 0 : index
    %c0_52 = arith.constant 0 : index
    %39 = vector.load %arg2[%c5, %c0_51, %c0_52] : memref<16x4x8xf32, #tpu.memory_space<vmem>>, vector<1x4x8xf32>
    %40 = vector.shape_cast %39 : vector<1x4x8xf32> to vector<4x8xf32>
    %cst_53 = arith.constant dense<0.000000e+00> : vector<64x8xf32>
    %41 = tpu.matmul %38, %40, %cst_53 {dimension_numbers = #tpu.dot_dimension_numbers<[1], [0], [0], [1], [0, 0, 1, 1], [], []>} : vector<64x4xf32>, vector<4x8xf32>, vector<64x8xf32> -> vector<64x8xf32>
    %42 = arith.addf %35, %41 : vector<64x8xf32>
    %c0_54 = arith.constant 0 : index
    %c1_55 = arith.constant 1 : index
    %c0_56 = arith.constant 0 : index
    %c0_57 = arith.constant 0 : index
    %c1_58 = arith.constant 1 : index
    %c0_59 = arith.constant 0 : index
    %43 = vector.load %arg1[%c0_54, %c1_55, %c0_56, %c0_57, %c1_58, %c0_59] : memref<1x2x9x2x9x4xf32, #tpu.memory_space<vmem>>, vector<1x1x8x1x8x4xf32>
    %44 = vector.shape_cast %43 : vector<1x1x8x1x8x4xf32> to vector<8x8x4xf32>
    %45 = vector.shape_cast %44 : vector<8x8x4xf32> to vector<64x4xf32>
    %c6 = arith.constant 6 : index
    %c0_60 = arith.constant 0 : index
    %c0_61 = arith.constant 0 : index
    %46 = vector.load %arg2[%c6, %c0_60, %c0_61] : memref<16x4x8xf32, #tpu.memory_space<vmem>>, vector<1x4x8xf32>
    %47 = vector.shape_cast %46 : vector<1x4x8xf32> to vector<4x8xf32>
    %cst_62 = arith.constant dense<0.000000e+00> : vector<64x8xf32>
    %48 = tpu.matmul %45, %47, %cst_62 {dimension_numbers = #tpu.dot_dimension_numbers<[1], [0], [0], [1], [0, 0, 1, 1], [], []>} : vector<64x4xf32>, vector<4x8xf32>, vector<64x8xf32> -> vector<64x8xf32>
    %49 = arith.addf %42, %48 : vector<64x8xf32>
    %c0_63 = arith.constant 0 : index
    %c1_64 = arith.constant 1 : index
    %c0_65 = arith.constant 0 : index
    %c1_66 = arith.constant 1 : index
    %c1_67 = arith.constant 1 : index
    %c0_68 = arith.constant 0 : index
    %50 = vector.load %arg1[%c0_63, %c1_64, %c0_65, %c1_66, %c1_67, %c0_68] : memref<1x2x9x2x9x4xf32, #tpu.memory_space<vmem>>, vector<1x1x8x1x8x4xf32>
    %51 = vector.shape_cast %50 : vector<1x1x8x1x8x4xf32> to vector<8x8x4xf32>
    %52 = vector.shape_cast %51 : vector<8x8x4xf32> to vector<64x4xf32>
    %c7 = arith.constant 7 : index
    %c0_69 = arith.constant 0 : index
    %c0_70 = arith.constant 0 : index
    %53 = vector.load %arg2[%c7, %c0_69, %c0_70] : memref<16x4x8xf32, #tpu.memory_space<vmem>>, vector<1x4x8xf32>
    %54 = vector.shape_cast %53 : vector<1x4x8xf32> to vector<4x8xf32>
    %cst_71 = arith.constant dense<0.000000e+00> : vector<64x8xf32>
    %55 = tpu.matmul %52, %54, %cst_71 {dimension_numbers = #tpu.dot_dimension_numbers<[1], [0], [0], [1], [0, 0, 1, 1], [], []>} : vector<64x4xf32>, vector<4x8xf32>, vector<64x8xf32> -> vector<64x8xf32>
    %56 = arith.addf %49, %55 : vector<64x8xf32>
    %c0_72 = arith.constant 0 : index
    %c0_73 = arith.constant 0 : index
    %c1_74 = arith.constant 1 : index
    %c0_75 = arith.constant 0 : index
    %c0_76 = arith.constant 0 : index
    %c0_77 = arith.constant 0 : index
    %57 = vector.load %arg1[%c0_72, %c0_73, %c1_74, %c0_75, %c0_76, %c0_77] : memref<1x2x9x2x9x4xf32, #tpu.memory_space<vmem>>, vector<1x1x8x1x8x4xf32>
    %58 = vector.shape_cast %57 : vector<1x1x8x1x8x4xf32> to vector<8x8x4xf32>
    %59 = vector.shape_cast %58 : vector<8x8x4xf32> to vector<64x4xf32>
    %c8 = arith.constant 8 : index
    %c0_78 = arith.constant 0 : index
    %c0_79 = arith.constant 0 : index
    %60 = vector.load %arg2[%c8, %c0_78, %c0_79] : memref<16x4x8xf32, #tpu.memory_space<vmem>>, vector<1x4x8xf32>
    %61 = vector.shape_cast %60 : vector<1x4x8xf32> to vector<4x8xf32>
    %cst_80 = arith.constant dense<0.000000e+00> : vector<64x8xf32>
    %62 = tpu.matmul %59, %61, %cst_80 {dimension_numbers = #tpu.dot_dimension_numbers<[1], [0], [0], [1], [0, 0, 1, 1], [], []>} : vector<64x4xf32>, vector<4x8xf32>, vector<64x8xf32> -> vector<64x8xf32>
    %63 = arith.addf %56, %62 : vector<64x8xf32>
    %c0_81 = arith.constant 0 : index
    %c0_82 = arith.constant 0 : index
    %c1_83 = arith.constant 1 : index
    %c1_84 = arith.constant 1 : index
    %c0_85 = arith.constant 0 : index
    %c0_86 = arith.constant 0 : index
    %64 = vector.load %arg1[%c0_81, %c0_82, %c1_83, %c1_84, %c0_85, %c0_86] : memref<1x2x9x2x9x4xf32, #tpu.memory_space<vmem>>, vector<1x1x8x1x8x4xf32>
    %65 = vector.shape_cast %64 : vector<1x1x8x1x8x4xf32> to vector<8x8x4xf32>
    %66 = vector.shape_cast %65 : vector<8x8x4xf32> to vector<64x4xf32>
    %c9 = arith.constant 9 : index
    %c0_87 = arith.constant 0 : index
    %c0_88 = arith.constant 0 : index
    %67 = vector.load %arg2[%c9, %c0_87, %c0_88] : memref<16x4x8xf32, #tpu.memory_space<vmem>>, vector<1x4x8xf32>
    %68 = vector.shape_cast %67 : vector<1x4x8xf32> to vector<4x8xf32>
    %cst_89 = arith.constant dense<0.000000e+00> : vector<64x8xf32>
    %69 = tpu.matmul %66, %68, %cst_89 {dimension_numbers = #tpu.dot_dimension_numbers<[1], [0], [0], [1], [0, 0, 1, 1], [], []>} : vector<64x4xf32>, vector<4x8xf32>, vector<64x8xf32> -> vector<64x8xf32>
    %70 = arith.addf %63, %69 : vector<64x8xf32>
    %c0_90 = arith.constant 0 : index
    %c0_91 = arith.constant 0 : index
    %c1_92 = arith.constant 1 : index
    %c0_93 = arith.constant 0 : index
    %c1_94 = arith.constant 1 : index
    %c0_95 = arith.constant 0 : index
    %71 = vector.load %arg1[%c0_90, %c0_91, %c1_92, %c0_93, %c1_94, %c0_95] : memref<1x2x9x2x9x4xf32, #tpu.memory_space<vmem>>, vector<1x1x8x1x8x4xf32>
    %72 = vector.shape_cast %71 : vector<1x1x8x1x8x4xf32> to vector<8x8x4xf32>
    %73 = vector.shape_cast %72 : vector<8x8x4xf32> to vector<64x4xf32>
    %c10 = arith.constant 10 : index
    %c0_96 = arith.constant 0 : index
    %c0_97 = arith.constant 0 : index
    %74 = vector.load %arg2[%c10, %c0_96, %c0_97] : memref<16x4x8xf32, #tpu.memory_space<vmem>>, vector<1x4x8xf32>
    %75 = vector.shape_cast %74 : vector<1x4x8xf32> to vector<4x8xf32>
    %cst_98 = arith.constant dense<0.000000e+00> : vector<64x8xf32>
    %76 = tpu.matmul %73, %75, %cst_98 {dimension_numbers = #tpu.dot_dimension_numbers<[1], [0], [0], [1], [0, 0, 1, 1], [], []>} : vector<64x4xf32>, vector<4x8xf32>, vector<64x8xf32> -> vector<64x8xf32>
    %77 = arith.addf %70, %76 : vector<64x8xf32>
    %c0_99 = arith.constant 0 : index
    %c0_100 = arith.constant 0 : index
    %c1_101 = arith.constant 1 : index
    %c1_102 = arith.constant 1 : index
    %c1_103 = arith.constant 1 : index
    %c0_104 = arith.constant 0 : index
    %78 = vector.load %arg1[%c0_99, %c0_100, %c1_101, %c1_102, %c1_103, %c0_104] : memref<1x2x9x2x9x4xf32, #tpu.memory_space<vmem>>, vector<1x1x8x1x8x4xf32>
    %79 = vector.shape_cast %78 : vector<1x1x8x1x8x4xf32> to vector<8x8x4xf32>
    %80 = vector.shape_cast %79 : vector<8x8x4xf32> to vector<64x4xf32>
    %c11 = arith.constant 11 : index
    %c0_105 = arith.constant 0 : index
    %c0_106 = arith.constant 0 : index
    %81 = vector.load %arg2[%c11, %c0_105, %c0_106] : memref<16x4x8xf32, #tpu.memory_space<vmem>>, vector<1x4x8xf32>
    %82 = vector.shape_cast %81 : vector<1x4x8xf32> to vector<4x8xf32>
    %cst_107 = arith.constant dense<0.000000e+00> : vector<64x8xf32>
    %83 = tpu.matmul %80, %82, %cst_107 {dimension_numbers = #tpu.dot_dimension_numbers<[1], [0], [0], [1], [0, 0, 1, 1], [], []>} : vector<64x4xf32>, vector<4x8xf32>, vector<64x8xf32> -> vector<64x8xf32>
    %84 = arith.addf %77, %83 : vector<64x8xf32>
    %c0_108 = arith.constant 0 : index
    %c1_109 = arith.constant 1 : index
    %c1_110 = arith.constant 1 : index
    %c0_111 = arith.constant 0 : index
    %c0_112 = arith.constant 0 : index
    %c0_113 = arith.constant 0 : index
    %85 = vector.load %arg1[%c0_108, %c1_109, %c1_110, %c0_111, %c0_112, %c0_113] : memref<1x2x9x2x9x4xf32, #tpu.memory_space<vmem>>, vector<1x1x8x1x8x4xf32>
    %86 = vector.shape_cast %85 : vector<1x1x8x1x8x4xf32> to vector<8x8x4xf32>
    %87 = vector.shape_cast %86 : vector<8x8x4xf32> to vector<64x4xf32>
    %c12 = arith.constant 12 : index
    %c0_114 = arith.constant 0 : index
    %c0_115 = arith.constant 0 : index
    %88 = vector.load %arg2[%c12, %c0_114, %c0_115] : memref<16x4x8xf32, #tpu.memory_space<vmem>>, vector<1x4x8xf32>
    %89 = vector.shape_cast %88 : vector<1x4x8xf32> to vector<4x8xf32>
    %cst_116 = arith.constant dense<0.000000e+00> : vector<64x8xf32>
    %90 = tpu.matmul %87, %89, %cst_116 {dimension_numbers = #tpu.dot_dimension_numbers<[1], [0], [0], [1], [0, 0, 1, 1], [], []>} : vector<64x4xf32>, vector<4x8xf32>, vector<64x8xf32> -> vector<64x8xf32>
    %91 = arith.addf %84, %90 : vector<64x8xf32>
    %c0_117 = arith.constant 0 : index
    %c1_118 = arith.constant 1 : index
    %c1_119 = arith.constant 1 : index
    %c1_120 = arith.constant 1 : index
    %c0_121 = arith.constant 0 : index
    %c0_122 = arith.constant 0 : index
    %92 = vector.load %arg1[%c0_117, %c1_118, %c1_119, %c1_120, %c0_121, %c0_122] : memref<1x2x9x2x9x4xf32, #tpu.memory_space<vmem>>, vector<1x1x8x1x8x4xf32>
    %93 = vector.shape_cast %92 : vector<1x1x8x1x8x4xf32> to vector<8x8x4xf32>
    %94 = vector.shape_cast %93 : vector<8x8x4xf32> to vector<64x4xf32>
    %c13 = arith.constant 13 : index
    %c0_123 = arith.constant 0 : index
    %c0_124 = arith.constant 0 : index
    %95 = vector.load %arg2[%c13, %c0_123, %c0_124] : memref<16x4x8xf32, #tpu.memory_space<vmem>>, vector<1x4x8xf32>
    %96 = vector.shape_cast %95 : vector<1x4x8xf32> to vector<4x8xf32>
    %cst_125 = arith.constant dense<0.000000e+00> : vector<64x8xf32>
    %97 = tpu.matmul %94, %96, %cst_125 {dimension_numbers = #tpu.dot_dimension_numbers<[1], [0], [0], [1], [0, 0, 1, 1], [], []>} : vector<64x4xf32>, vector<4x8xf32>, vector<64x8xf32> -> vector<64x8xf32>
    %98 = arith.addf %91, %97 : vector<64x8xf32>
    %c0_126 = arith.constant 0 : index
    %c1_127 = arith.constant 1 : index
    %c1_128 = arith.constant 1 : index
    %c0_129 = arith.constant 0 : index
    %c1_130 = arith.constant 1 : index
    %c0_131 = arith.constant 0 : index
    %99 = vector.load %arg1[%c0_126, %c1_127, %c1_128, %c0_129, %c1_130, %c0_131] : memref<1x2x9x2x9x4xf32, #tpu.memory_space<vmem>>, vector<1x1x8x1x8x4xf32>
    %100 = vector.shape_cast %99 : vector<1x1x8x1x8x4xf32> to vector<8x8x4xf32>
    %101 = vector.shape_cast %100 : vector<8x8x4xf32> to vector<64x4xf32>
    %c14 = arith.constant 14 : index
    %c0_132 = arith.constant 0 : index
    %c0_133 = arith.constant 0 : index
    %102 = vector.load %arg2[%c14, %c0_132, %c0_133] : memref<16x4x8xf32, #tpu.memory_space<vmem>>, vector<1x4x8xf32>
    %103 = vector.shape_cast %102 : vector<1x4x8xf32> to vector<4x8xf32>
    %cst_134 = arith.constant dense<0.000000e+00> : vector<64x8xf32>
    %104 = tpu.matmul %101, %103, %cst_134 {dimension_numbers = #tpu.dot_dimension_numbers<[1], [0], [0], [1], [0, 0, 1, 1], [], []>} : vector<64x4xf32>, vector<4x8xf32>, vector<64x8xf32> -> vector<64x8xf32>
    %105 = arith.addf %98, %104 : vector<64x8xf32>
    %c0_135 = arith.constant 0 : index
    %c1_136 = arith.constant 1 : index
    %c1_137 = arith.constant 1 : index
    %c1_138 = arith.constant 1 : index
    %c1_139 = arith.constant 1 : index
    %c0_140 = arith.constant 0 : index
    %106 = vector.load %arg1[%c0_135, %c1_136, %c1_137, %c1_138, %c1_139, %c0_140] : memref<1x2x9x2x9x4xf32, #tpu.memory_space<vmem>>, vector<1x1x8x1x8x4xf32>
    %107 = vector.shape_cast %106 : vector<1x1x8x1x8x4xf32> to vector<8x8x4xf32>
    %108 = vector.shape_cast %107 : vector<8x8x4xf32> to vector<64x4xf32>
    %c15 = arith.constant 15 : index
    %c0_141 = arith.constant 0 : index
    %c0_142 = arith.constant 0 : index
    %109 = vector.load %arg2[%c15, %c0_141, %c0_142] : memref<16x4x8xf32, #tpu.memory_space<vmem>>, vector<1x4x8xf32>
    %110 = vector.shape_cast %109 : vector<1x4x8xf32> to vector<4x8xf32>
    %cst_143 = arith.constant dense<0.000000e+00> : vector<64x8xf32>
    %111 = tpu.matmul %108, %110, %cst_143 {dimension_numbers = #tpu.dot_dimension_numbers<[1], [0], [0], [1], [0, 0, 1, 1], [], []>} : vector<64x4xf32>, vector<4x8xf32>, vector<64x8xf32> -> vector<64x8xf32>
    %112 = arith.addf %105, %111 : vector<64x8xf32>
    %cst_144 = arith.constant dense<0.000000e+00> : vector<8xf32>
    %113 = vector.multi_reduction <add>, %112, %cst_144 [0] : vector<64x8xf32> to vector<8xf32>
    %114 = vector.shape_cast %113 : vector<8xf32> to vector<1x8xf32>
    %115 = arith.mulf %112, %112 : vector<64x8xf32>
    %cst_145 = arith.constant dense<0.000000e+00> : vector<8xf32>
    %116 = vector.multi_reduction <add>, %115, %cst_145 [0] : vector<64x8xf32> to vector<8xf32>
    %117 = vector.shape_cast %116 : vector<8xf32> to vector<1x8xf32>
    %cst_146 = arith.constant 1.562500e-02 : f32
    %118 = vector.broadcast %cst_146 : f32 to vector<1x8xf32>
    %119 = arith.mulf %114, %118 : vector<1x8xf32>
    %cst_147 = arith.constant 1.562500e-02 : f32
    %120 = vector.broadcast %cst_147 : f32 to vector<1x8xf32>
    %121 = arith.mulf %117, %120 : vector<1x8xf32>
    %122 = arith.mulf %119, %119 : vector<1x8xf32>
    %123 = arith.subf %121, %122 : vector<1x8xf32>
    %cst_148 = arith.constant 0.000000e+00 : f32
    %124 = vector.broadcast %cst_148 : f32 to vector<1x8xf32>
    %125 = arith.maximumf %123, %124 : vector<1x8xf32>
    %126 = vector.broadcast %119 : vector<1x8xf32> to vector<64x8xf32>
    %127 = arith.subf %112, %126 : vector<64x8xf32>
    %cst_149 = arith.constant 9.99999974E-6 : f32
    %128 = vector.broadcast %cst_149 : f32 to vector<1x8xf32>
    %129 = arith.addf %125, %128 : vector<1x8xf32>
    %130 = math.rsqrt %129 : vector<1x8xf32>
    %131 = vector.broadcast %130 : vector<1x8xf32> to vector<64x8xf32>
    %132 = arith.mulf %127, %131 : vector<64x8xf32>
    %cst_150 = arith.constant 0.000000e+00 : f32
    %133 = vector.broadcast %cst_150 : f32 to vector<64x8xf32>
    %134 = arith.cmpf oge, %132, %133 : vector<64x8xf32>
    %cst_151 = arith.constant 2.000000e-01 : f32
    %135 = vector.broadcast %cst_151 : f32 to vector<64x8xf32>
    %136 = arith.mulf %135, %132 : vector<64x8xf32>
    %137 = arith.select %134, %132, %136 : vector<64x8xi1>, vector<64x8xf32>
    %138 = tpu.transpose %137, [1, 0] : vector<64x8xf32> -> vector<8x64xf32>
    %c0_152 = arith.constant 0 : index
    %c0_153 = arith.constant 0 : index
    %c0_154 = arith.constant 0 : index
    %139 = vector.load %arg3[%c0_152, %c0_153, %c0_154] : memref<1x8x64xf32, #tpu.memory_space<vmem>>, vector<1x8x64xf32>
    %140 = vector.shape_cast %139 : vector<1x8x64xf32> to vector<8x64xf32>
    %141 = vector.shape_cast %138 : vector<8x64xf32> to vector<1x8x64xf32>
    tpu.vector_store %arg3[%c0_152, %c0_153, %c0_154], %141 {strides = array<i32>} : memref<1x8x64xf32, #tpu.memory_space<vmem>>, vector<1x8x64xf32>,
    return
  }
  func.func @transform_0(%arg0: i32) -> (i32, i32, i32, i32, i32, i32) {
    %c0_i32 = arith.constant 0 : i32
    %c0_i32_0 = arith.constant 0 : i32
    %c0_i32_1 = arith.constant 0 : i32
    %c0_i32_2 = arith.constant 0 : i32
    %c0_i32_3 = arith.constant 0 : i32
    %c0_i32_4 = arith.constant 0 : i32
    return %arg0, %c0_i32, %c0_i32_0, %c0_i32_1, %c0_i32_2, %c0_i32_3 : i32, i32, i32, i32, i32, i32
  }
  func.func @transform_1(%arg0: i32) -> (i32, i32, i32) {
    %c0_i32 = arith.constant 0 : i32
    %c0_i32_0 = arith.constant 0 : i32
    %c0_i32_1 = arith.constant 0 : i32
    %c0_i32_2 = arith.constant 0 : i32
    return %c0_i32, %c0_i32_0, %c0_i32_1 : i32, i32, i32
  }
  func.func @transform_2(%arg0: i32) -> (i32, i32, i32) {
    %c0_i32 = arith.constant 0 : i32
    %c0_i32_0 = arith.constant 0 : i32
    %c0_i32_1 = arith.constant 0 : i32
    return %arg0, %c0_i32, %c0_i32_0 : i32, i32, i32
  }
}

</mosaic_0001>

<bundles_post_ra>
// kernel: block_forward.1
= control target key start
LH: loop header
LB: loop body
LE: loop exit
PB: predicated region body
PF: predicated region fallthrough
CT: control target
= control target key end

     0   :  { %s3402_s9 = smov 0   ;;  %s4104_s0 = inlined_call_operand.vmem [shape: f32[2,2,9,2,9,4], index: 0, kind: input, shape index: {}]   ;;  %s4105_s1 = inlined_call_operand.vmem [shape: f32[16,4,8], index: 1, kind: input, shape index: {}]   ;;  %s4106_s2 = inlined_call_operand.vmem [shape: f32[2,8,64], index: 2, kind: output, shape index: {}]  }
   0x1 LB: > { %s2719_s10 = sadd.s32 4294967295, %s3385_s9   ;;  %p2723_p0 = scmp.ge.s32.totalorder %s3385_s9, 1  ;;  %s3385_s9 = sphi %s3402_s9, %s12_s9  }
   0x2   : > { %p112_p1 = scmp.lt.s32.totalorder %s3385_s9, 3 }
   0x4   : > { %p113_p2 = pnand %p2723_p0, %p112_p1 }
   0x6   : > { %116 = sbr.rel (%p113_p2) target bundleno = 514 (0x202), region = 28 }
   0xb   : > { %v2734_v0 = vld [vmem:[%s4105_s1 + $0x4] sm:$0xf]  ;;  %vm187_vm0 = vcmask 1043456   ;;  %v150_v1 = vld [vmem:[%s4105_s1] sm:$0xf]  ;;  %p133_p3 = scmp.lt.s32.totalorder %s2719_s10, 1 }
   0xc   : > { %3143 = vmatprep.subr.msk.mxu0 %vm187_vm0, %v2734_v0  ;;  %3157 = vmatprep.subr.msk.mxu1 %vm187_vm0, %v150_v1  ;;  %v2753_v2 = vld [vmem:[%s4105_s1 + $0x8] sm:$0xf]  ;;  %v2771_v3 = vld [vmem:[%s4105_s1 + $0xc] sm:$0xf]  ;;  %vm162_vm1 = vcmask 31744   ;;  %vm2534_vm2 = vcmask 64512  }
   0xd   : > { %3144 = vmatpush3.msk.msra.mxu0 %vm187_vm0, %v2734_v0  ;;  %s4122_s10 = smov (!%p133_p3, %s2719_s10), 1  ;;  %3158 = vmatpush3.msk.msra.mxu1 %vm187_vm0, %v150_v1  ;;  %v2789_v10 = vld [vmem:[%s4105_s1 + $0x10] sm:$0xf]  ;;  %v2807_v11 = vld [vmem:[%s4105_s1 + $0x14] sm:$0xf]  ;;  %vm2664_vm11 = vcmask 523264  }
   0xe   : > { %3171 = vmatprep.subr.msk.mxu0 %vm187_vm0, %v2753_v2  ;;  %3185 = vmatprep.subr.msk.mxu1 %vm187_vm0, %v2771_v3  ;;  %s3367_s19 = smul.u32 576, %s4122_s10  ;;  %v2825_v28 = vld [vmem:[%s4105_s1 + $0x18] sm:$0xf]  ;;  %v2843_v29 = vld [vmem:[%s4105_s1 + $0x1c] sm:$0xf]  ;;  %s2725_s21 = sshll.u32 %s4122_s10, 3 }
   0xf   : > { %v2861_v46 = vld [vmem:[%s4105_s1 + $0x20] sm:$0xf]  ;;  %v2879_v47 = vld [vmem:[%s4105_s1 + $0x24] sm:$0xf]  ;;  %v2897_v0 = vld [vmem:[%s4105_s1 + $0x28] sm:$0xf]  ;;  %s141_s24 = scalar_lea.vmem %s4106_s2, %s2725_s21 }
  0x10   : > { %s3434_s22 = scalar_lea.vmem %s4104_s0, %s3367_s19  ;;  %v2915_v1 = vld [vmem:[%s4105_s1 + $0x2c] sm:$0xf] }
  0x11   : > { %v2726_v4 = vld [vmem:[%s3434_s22 + $0x10] sm:$0xff]  ;;  %v142_v5 = vld [vmem:[%s3434_s22] sm:$0xff] }
  0x12   : > { %v3439_v6 = vld [vmem:[%s3434_s22 + $0x30] sm:$0xff]  ;;  %3145 = vmatprep.mubr.msk.f32.mxu0 %vm162_vm1, %v2726_v4  ;;  %3159 = vmatprep.mubr.msk.f32.mxu1 %vm162_vm1, %v142_v5  ;;  %v3444_v7 = vld [vmem:[%s3434_s22 + $0x20] sm:$0xff] }
  0x13   : > { %v3447_v8 = vld [vmem:[%s3434_s22 + $0x50] sm:$0xff]  ;;  %v3450_v9 = vld [vmem:[%s3434_s22 + $0x40] sm:$0xff]  ;;  %3146 = vmatmul.mubr.msk.f32.vlgmr.msra.gmra.mxu0 %vm162_vm1, %v3439_v6  ;;  %3160 = vmatmul.mubr.msk.f32.vlgmr.msra.gmra.mxu1 %vm162_vm1, %v3444_v7 }
  0x14   : > { %3172 = vmatpush3.msk.msra.mxu0 %vm187_vm0, %v2753_v2  ;;  %3186 = vmatpush3.msk.msra.mxu1 %vm187_vm0, %v2771_v3  ;;  %v3465_v12 = vld [vmem:[%s3434_s22 + $0x70] sm:$0xff]  ;;  %v3468_v13 = vld [vmem:[%s3434_s22 + $0x60] sm:$0xff] }
  0x15   : > { %3148 = vmatprep.mubr.msk.f32.mxu0 %vm162_vm1, %v3447_v8  ;;  %3162 = vmatprep.mubr.msk.f32.mxu1 %vm162_vm1, %v3450_v9  ;;  %v3475_v14 = vld [vmem:[%s3434_s22 + $0x90] sm:$0xff]  ;;  %v3478_v15 = vld [vmem:[%s3434_s22 + $0x80] sm:$0xff] }
  0x16   : > { %3199 = vmatprep.subr.msk.mxu0 %vm187_vm0, %v2789_v10  ;;  %3213 = vmatprep.subr.msk.mxu1 %vm187_vm0, %v2807_v11  ;;  %v3491_v16 = vld [vmem:[%s3434_s22 + $0xb0] sm:$0xff]  ;;  %v3494_v17 = vld [vmem:[%s3434_s22 + $0xa0] sm:$0xff] }
  0x17   : > { %3149 = vmatmul.mubr.msk.f32.gmra.mxu0 %vm162_vm1, %v3465_v12  ;;  %3163 = vmatmul.mubr.msk.f32.gmra.mxu1 %vm162_vm1, %v3468_v13  ;;  %v3497_v18 = vld [vmem:[%s3434_s22 + $0xd0] sm:$0xff]  ;;  %v3500_v19 = vld [vmem:[%s3434_s22 + $0xc0] sm:$0xff] }
  0x18   : > { %3151 = vmatprep.mubr.msk.f32.mxu0 %vm162_vm1, %v3475_v14  ;;  %3165 = vmatprep.mubr.msk.f32.mxu1 %vm162_vm1, %v3478_v15  ;;  %v3511_v20 = vld [vmem:[%s3434_s22 + $0xf0] sm:$0xff]  ;;  %v3514_v21 = vld [vmem:[%s3434_s22 + $0xe0] sm:$0xff] }
  0x19   : > { %v428_v22 = vld [vmem:[%s3434_s22 + $0x1] sm:$0xff]  ;;  %v2763_v23 = vld [vmem:[%s3434_s22 + $0x11] sm:$0xff] }
  0x1a   : > { %v3525_v24 = vld [vmem:[%s3434_s22 + $0x21] sm:$0xff]  ;;  %v3528_v25 = vld [vmem:[%s3434_s22 + $0x31] sm:$0xff] }
  0x1b   : > { %3152 = vmatmul.mubr.msk.f32.gmra.mxu0 %vm162_vm1, %v3491_v16  ;;  %3166 = vmatmul.mubr.msk.f32.gmra.mxu1 %vm162_vm1, %v3494_v17  ;;  %v3531_v26 = vld [vmem:[%s3434_s22 + $0x41] sm:$0xff]  ;;  %v3534_v27 = vld [vmem:[%s3434_s22 + $0x51] sm:$0xff] }
  0x1c   : > { %3154 = vmatprep.mubr.msk.f32.mxu0 %vm162_vm1, %v3497_v18  ;;  %3168 = vmatprep.mubr.msk.f32.mxu1 %vm162_vm1, %v3500_v19  ;;  %v3549_v30 = vld [vmem:[%s3434_s22 + $0x61] sm:$0xff]  ;;  %v3552_v31 = vld [vmem:[%s3434_s22 + $0x71] sm:$0xff] }
  0x1d   : > { %v3559_v32 = vld [vmem:[%s3434_s22 + $0x81] sm:$0xff]  ;;  %v3562_v33 = vld [vmem:[%s3434_s22 + $0x91] sm:$0xff] }
  0x1e   : > { %v3575_v34 = vld [vmem:[%s3434_s22 + $0xa1] sm:$0xff]  ;;  %v3578_v35 = vld [vmem:[%s3434_s22 + $0xb1] sm:$0xff] }
  0x1f   : > { %3155 = vmatmul.mubr.msk.f32.gmra.mxu0 %vm162_vm1, %v3511_v20  ;;  %3169 = vmatmul.mubr.msk.f32.gmra.mxu1 %vm162_vm1, %v3514_v21  ;;  %v3581_v36 = vld [vmem:[%s3434_s22 + $0xc1] sm:$0xff]  ;;  %v3584_v37 = vld [vmem:[%s3434_s22 + $0xd1] sm:$0xff] }
  0x20   : > { %3173 = vmatprep.mubr.msk.f32.mxu0 %vm162_vm1, %v428_v22  ;;  %3187 = vmatprep.mubr.msk.f32.mxu1 %vm162_vm1, %v2763_v23  ;;  %v3595_v38 = vld [vmem:[%s3434_s22 + $0xe1] sm:$0xff]  ;;  %v3598_v39 = vld [vmem:[%s3434_s22 + $0xf1] sm:$0xff] }
  0x21   : > { %v2781_v40 = vld [vmem:[%s3434_s22 + $0x120] sm:$0xff]  ;;  %v2799_v41 = vld [vmem:[%s3434_s22 + $0x130] sm:$0xff] }
  0x22   : > { %v3609_v42 = vld [vmem:[%s3434_s22 + $0x140] sm:$0xff]  ;;  %v3612_v43 = vld [vmem:[%s3434_s22 + $0x150] sm:$0xff] }
  0x23   : > { %3174 = vmatmul.mubr.msk.f32.vlgmr.msra.gmra.mxu0 %vm162_vm1, %v3525_v24  ;;  %3188 = vmatmul.mubr.msk.f32.vlgmr.msra.gmra.mxu1 %vm162_vm1, %v3528_v25  ;;  %v3615_v44 = vld [vmem:[%s3434_s22 + $0x160] sm:$0xff]  ;;  %v3618_v45 = vld [vmem:[%s3434_s22 + $0x170] sm:$0xff] }
  0x24   : > { %3200 = vmatpush3.msk.msra.mxu0 %vm187_vm0, %v2789_v10  ;;  %3214 = vmatpush3.msk.msra.mxu1 %vm187_vm0, %v2807_v11  ;;  %v3633_v48 = vld [vmem:[%s3434_s22 + $0x180] sm:$0xff]  ;;  %v3636_v49 = vld [vmem:[%s3434_s22 + $0x190] sm:$0xff] }
  0x25   : > { %3176 = vmatprep.mubr.msk.f32.mxu0 %vm162_vm1, %v3531_v26  ;;  %3190 = vmatprep.mubr.msk.f32.mxu1 %vm162_vm1, %v3534_v27  ;;  %v3643_v50 = vld [vmem:[%s3434_s22 + $0x1a0] sm:$0xff]  ;;  %v3646_v51 = vld [vmem:[%s3434_s22 + $0x1b0] sm:$0xff] }
  0x26   : > { %3227 = vmatprep.subr.msk.mxu0 %vm187_vm0, %v2825_v28  ;;  %3241 = vmatprep.subr.msk.mxu1 %vm187_vm0, %v2843_v29  ;;  %v3659_v52 = vld [vmem:[%s3434_s22 + $0x1c0] sm:$0xff]  ;;  %v3662_v53 = vld [vmem:[%s3434_s22 + $0x1d0] sm:$0xff] }
  0x27   : > { %3177 = vmatmul.mubr.msk.f32.gmra.mxu0 %vm162_vm1, %v3549_v30  ;;  %3191 = vmatmul.mubr.msk.f32.gmra.mxu1 %vm162_vm1, %v3552_v31  ;;  %v3665_v54 = vld [vmem:[%s3434_s22 + $0x1e0] sm:$0xff]  ;;  %v3668_v55 = vld [vmem:[%s3434_s22 + $0x1f0] sm:$0xff] }
  0x28   : > { %3179 = vmatprep.mubr.msk.f32.mxu0 %vm162_vm1, %v3559_v32  ;;  %3193 = vmatprep.mubr.msk.f32.mxu1 %vm162_vm1, %v3562_v33  ;;  %v3679_v56 = vld [vmem:[%s3434_s22 + $0x200] sm:$0xff]  ;;  %v3682_v57 = vld [vmem:[%s3434_s22 + $0x210] sm:$0xff] }
  0x29   : > { %v2817_v58 = vld [vmem:[%s3434_s22 + $0x121] sm:$0xff]  ;;  %v2835_v59 = vld [vmem:[%s3434_s22 + $0x131] sm:$0xff] }
  0x2a   : > { %v3693_v60 = vld [vmem:[%s3434_s22 + $0x141] sm:$0xff]  ;;  %v3696_v61 = vld [vmem:[%s3434_s22 + $0x151] sm:$0xff] }
  0x2b   : > { %3180 = vmatmul.mubr.msk.f32.gmra.mxu0 %vm162_vm1, %v3575_v34  ;;  %3194 = vmatmul.mubr.msk.f32.gmra.mxu1 %vm162_vm1, %v3578_v35  ;;  %v3699_v62 = vld [vmem:[%s3434_s22 + $0x161] sm:$0xff]  ;;  %v3702_v63 = vld [vmem:[%s3434_s22 + $0x171] sm:$0xff] }
  0x2c   : > { %3182 = vmatprep.mubr.msk.f32.mxu0 %vm162_vm1, %v3581_v36  ;;  %3196 = vmatprep.mubr.msk.f32.mxu1 %vm162_vm1, %v3584_v37  ;;  %v3717_v2 = vld [vmem:[%s3434_s22 + $0x181] sm:$0xff]  ;;  %v3720_v3 = vld [vmem:[%s3434_s22 + $0x191] sm:$0xff] }
  0x2d   : > { %v3727_v4 = vld [vmem:[%s3434_s22 + $0x1a1] sm:$0xff]  ;;  %v3730_v5 = vld [vmem:[%s3434_s22 + $0x1b1] sm:$0xff] }
  0x2e   : > { %v3743_v10 = vld [vmem:[%s3434_s22 + $0x1c1] sm:$0xff]  ;;  %v3746_v11 = vld [vmem:[%s3434_s22 + $0x1d1] sm:$0xff] }
  0x2f   : > { %3183 = vmatmul.mubr.msk.f32.gmra.mxu0 %vm162_vm1, %v3595_v38  ;;  %3197 = vmatmul.mubr.msk.f32.gmra.mxu1 %vm162_vm1, %v3598_v39  ;;  %v3749_v22 = vld [vmem:[%s3434_s22 + $0x1e1] sm:$0xff]  ;;  %v3752_v23 = vld [vmem:[%s3434_s22 + $0x1f1] sm:$0xff] }
  0x30   : > { %3201 = vmatprep.mubr.msk.f32.mxu0 %vm162_vm1, %v2781_v40  ;;  %3215 = vmatprep.mubr.msk.f32.mxu1 %vm162_vm1, %v2799_v41  ;;  %v2933_v40 = vld [vmem:[%s4105_s1 + $0x30] sm:$0xf]  ;;  %v2951_v41 = vld [vmem:[%s4105_s1 + $0x34] sm:$0xf] }
  0x33   : > { %3202 = vmatmul.mubr.msk.f32.vlgmr.msra.gmra.mxu0 %vm162_vm1, %v3609_v42  ;;  %3216 = vmatmul.mubr.msk.f32.vlgmr.msra.gmra.mxu1 %vm162_vm1, %v3612_v43 }
  0x34   : > { %3228 = vmatpush3.msk.msra.mxu0 %vm187_vm0, %v2825_v28  ;;  %3242 = vmatpush3.msk.msra.mxu1 %vm187_vm0, %v2843_v29  ;;  %v3763_v28 = vld [vmem:[%s3434_s22 + $0x201] sm:$0xff]  ;;  %v3766_v29 = vld [vmem:[%s3434_s22 + $0x211] sm:$0xff] }
  0x35   : > { %3204 = vmatprep.mubr.msk.f32.mxu0 %vm162_vm1, %v3615_v44  ;;  %3218 = vmatprep.mubr.msk.f32.mxu1 %vm162_vm1, %v3618_v45 }
  0x36   : > { %3255 = vmatprep.subr.msk.mxu0 %vm187_vm0, %v2861_v46  ;;  %3269 = vmatprep.subr.msk.mxu1 %vm187_vm0, %v2879_v47 }
  0x37   : > { %3205 = vmatmul.mubr.msk.f32.gmra.mxu0 %vm162_vm1, %v3633_v48  ;;  %3219 = vmatmul.mubr.msk.f32.gmra.mxu1 %vm162_vm1, %v3636_v49 }
  0x38   : > { %3207 = vmatprep.mubr.msk.f32.mxu0 %vm162_vm1, %v3643_v50  ;;  %3221 = vmatprep.mubr.msk.f32.mxu1 %vm162_vm1, %v3646_v51 }
  0x3b   : > { %3208 = vmatmul.mubr.msk.f32.gmra.mxu0 %vm162_vm1, %v3659_v52  ;;  %3222 = vmatmul.mubr.msk.f32.gmra.mxu1 %vm162_vm1, %v3662_v53 }
  0x3c   : > { %3210 = vmatprep.mubr.msk.f32.mxu0 %vm162_vm1, %v3665_v54  ;;  %3224 = vmatprep.mubr.msk.f32.mxu1 %vm162_vm1, %v3668_v55 }
  0x3f   : > { %3211 = vmatmul.mubr.msk.f32.gmra.mxu0 %vm162_vm1, %v3679_v56  ;;  %3225 = vmatmul.mubr.msk.f32.gmra.mxu1 %vm162_vm1, %v3682_v57 }
  0x40   : > { %3229 = vmatprep.mubr.msk.f32.mxu0 %vm162_vm1, %v2817_v58  ;;  %3243 = vmatprep.mubr.msk.f32.mxu1 %vm162_vm1, %v2835_v59 }
  0x43   : > { %3230 = vmatmul.mubr.msk.f32.vlgmr.msra.gmra.mxu0 %vm162_vm1, %v3693_v60  ;;  %3244 = vmatmul.mubr.msk.f32.vlgmr.msra.gmra.mxu1 %vm162_vm1, %v3696_v61 }
  0x44   : > { %3256 = vmatpush3.msk.msra.mxu0 %vm187_vm0, %v2861_v46  ;;  %3270 = vmatpush3.msk.msra.mxu1 %vm187_vm0, %v2879_v47 }
  0x45   : > { %3232 = vmatprep.mubr.msk.f32.mxu0 %vm162_vm1, %v3699_v62  ;;  %3246 = vmatprep.mubr.msk.f32.mxu1 %vm162_vm1, %v3702_v63 }
  0x46   : > { %3283 = vmatprep.subr.msk.mxu0 %vm187_vm0, %v2897_v0  ;;  %3297 = vmatprep.subr.msk.mxu1 %vm187_vm0, %v2915_v1 }
  0x47   : > { %3233 = vmatmul.mubr.msk.f32.gmra.mxu0 %vm162_vm1, %v3717_v2  ;;  %3247 = vmatmul.mubr.msk.f32.gmra.mxu1 %vm162_vm1, %v3720_v3 }
  0x48   : > { %3235 = vmatprep.mubr.msk.f32.mxu0 %vm162_vm1, %v3727_v4  ;;  %3249 = vmatprep.mubr.msk.f32.mxu1 %vm162_vm1, %v3730_v5 }
  0x4b   : > { %3236 = vmatmul.mubr.msk.f32.gmra.mxu0 %vm162_vm1, %v3743_v10  ;;  %3250 = vmatmul.mubr.msk.f32.gmra.mxu1 %vm162_vm1, %v3746_v11 }
  0x4c   : > { %3238 = vmatprep.mubr.msk.f32.mxu0 %vm162_vm1, %v3749_v22  ;;  %3252 = vmatprep.mubr.msk.f32.mxu1 %vm162_vm1, %v3752_v23 }
  0x4f   : > { %3239 = vmatmul.mubr.msk.f32.gmra.mxu0 %vm162_vm1, %v3763_v28  ;;  %3253 = vmatmul.mubr.msk.f32.gmra.mxu1 %vm162_vm1, %v3766_v29 }
  0x50   : > { %3257 = vmatprep.mubr.msk.f32.mxu0 %vm162_vm1, %v3444_v7  ;;  %3271 = vmatprep.mubr.msk.f32.mxu1 %vm162_vm1, %v3439_v6  ;;  %v2860_v6 = vld [vmem:[%s3434_s22 + $0x100] sm:$0xff]  ;;  %v2878_v7 = vld [vmem:[%s3434_s22 + $0x110] sm:$0xff] }
  0x53   : > { %3258 = vmatmul.mubr.msk.f32.vlgmr.msra.gmra.mxu0 %vm162_vm1, %v3450_v9  ;;  %3272 = vmatmul.mubr.msk.f32.vlgmr.msra.gmra.mxu1 %vm162_vm1, %v3447_v8  ;;  %v2969_v8 = vld [vmem:[%s4105_s1 + $0x38] sm:$0xf]  ;;  %v2987_v9 = vld [vmem:[%s4105_s1 + $0x3c] sm:$0xf] }
  0x54   : > { %3284 = vmatpush3.msk.msra.mxu0 %vm187_vm0, %v2897_v0  ;;  %3298 = vmatpush3.msk.msra.mxu1 %vm187_vm0, %v2915_v1 }
  0x55   : > { %3260 = vmatprep.mubr.msk.f32.mxu0 %vm162_vm1, %v3468_v13  ;;  %3274 = vmatprep.mubr.msk.f32.mxu1 %vm162_vm1, %v3465_v12  ;;  %v2896_v12 = vld [vmem:[%s3434_s22 + $0x101] sm:$0xff]  ;;  %v2914_v13 = vld [vmem:[%s3434_s22 + $0x111] sm:$0xff] }
  0x56   : > { %3311 = vmatprep.subr.msk.mxu0 %vm187_vm0, %v2933_v40  ;;  %3325 = vmatprep.subr.msk.mxu1 %vm187_vm0, %v2951_v41 }
  0x57   : > { %3261 = vmatmul.mubr.msk.f32.gmra.mxu0 %vm162_vm1, %v3478_v15  ;;  %3275 = vmatmul.mubr.msk.f32.gmra.mxu1 %vm162_vm1, %v3475_v14  ;;  %v2932_v14 = vld [vmem:[%s3434_s22 + $0x220] sm:$0xff]  ;;  %v2950_v15 = vld [vmem:[%s3434_s22 + $0x230] sm:$0xff] }
  0x58   : > { %3263 = vmatprep.mubr.msk.f32.mxu0 %vm162_vm1, %v3494_v17  ;;  %3277 = vmatprep.mubr.msk.f32.mxu1 %vm162_vm1, %v3491_v16  ;;  %v2968_v16 = vld [vmem:[%s3434_s22 + $0x221] sm:$0xff]  ;;  %v2986_v17 = vld [vmem:[%s3434_s22 + $0x231] sm:$0xff] }
  0x5b   : > { %3264 = vmatmul.mubr.msk.f32.gmra.mxu0 %vm162_vm1, %v3500_v19  ;;  %3278 = vmatmul.mubr.msk.f32.gmra.mxu1 %vm162_vm1, %v3497_v18 }
  0x5c   : > { %3266 = vmatprep.mubr.msk.f32.mxu0 %vm162_vm1, %v3514_v21  ;;  %3280 = vmatprep.mubr.msk.f32.mxu1 %vm162_vm1, %v3511_v20 }
  0x5f   : > { %3267 = vmatmul.mubr.msk.f32.gmra.mxu0 %vm162_vm1, %v2860_v6  ;;  %3281 = vmatmul.mubr.msk.f32.gmra.mxu1 %vm162_vm1, %v2878_v7 }
  0x60   : > { %3285 = vmatprep.mubr.msk.f32.mxu0 %vm162_vm1, %v3525_v24  ;;  %3299 = vmatprep.mubr.msk.f32.mxu1 %vm162_vm1, %v3528_v25 }
  0x63   : > { %3286 = vmatmul.mubr.msk.f32.vlgmr.msra.gmra.mxu0 %vm162_vm1, %v3531_v26  ;;  %3300 = vmatmul.mubr.msk.f32.vlgmr.msra.gmra.mxu1 %vm162_vm1, %v3534_v27 }
  0x64   : > { %3312 = vmatpush3.msk.msra.mxu0 %vm187_vm0, %v2933_v40  ;;  %3326 = vmatpush3.msk.msra.mxu1 %vm187_vm0, %v2951_v41 }
  0x65   : > { %3288 = vmatprep.mubr.msk.f32.mxu0 %vm162_vm1, %v3549_v30  ;;  %3302 = vmatprep.mubr.msk.f32.mxu1 %vm162_vm1, %v3552_v31 }
  0x66   : > { %3339 = vmatprep.subr.msk.mxu0 %vm187_vm0, %v2969_v8  ;;  %3353 = vmatprep.subr.msk.mxu1 %vm187_vm0, %v2987_v9 }
  0x67   : > { %3289 = vmatmul.mubr.msk.f32.gmra.mxu0 %vm162_vm1, %v3559_v32  ;;  %3303 = vmatmul.mubr.msk.f32.gmra.mxu1 %vm162_vm1, %v3562_v33 }
  0x68   : > { %3291 = vmatprep.mubr.msk.f32.mxu0 %vm162_vm1, %v3575_v34  ;;  %3305 = vmatprep.mubr.msk.f32.mxu1 %vm162_vm1, %v3578_v35 }
  0x6b   : > { %3292 = vmatmul.mubr.msk.f32.gmra.mxu0 %vm162_vm1, %v3581_v36  ;;  %3306 = vmatmul.mubr.msk.f32.gmra.mxu1 %vm162_vm1, %v3584_v37 }
  0x6c   : > { %3294 = vmatprep.mubr.msk.f32.mxu0 %vm162_vm1, %v3595_v38  ;;  %3308 = vmatprep.mubr.msk.f32.mxu1 %vm162_vm1, %v3598_v39 }
  0x6f   : > { %3295 = vmatmul.mubr.msk.f32.gmra.mxu0 %vm162_vm1, %v2896_v12  ;;  %3309 = vmatmul.mubr.msk.f32.gmra.mxu1 %vm162_vm1, %v2914_v13 }
  0x70   : > { %3313 = vmatprep.mubr.msk.f32.mxu0 %vm162_vm1, %v3609_v42  ;;  %3327 = vmatprep.mubr.msk.f32.mxu1 %vm162_vm1, %v3612_v43 }
  0x73   : > { %3314 = vmatmul.mubr.msk.f32.vlgmr.msra.gmra.mxu0 %vm162_vm1, %v3615_v44  ;;  %3328 = vmatmul.mubr.msk.f32.vlgmr.msra.gmra.mxu1 %vm162_vm1, %v3618_v45 }
  0x74   : > { %3340 = vmatpush3.msk.msra.mxu0 %vm187_vm0, %v2969_v8  ;;  %3354 = vmatpush3.msk.msra.mxu1 %vm187_vm0, %v2987_v9 }
  0x75   : > { %3316 = vmatprep.mubr.msk.f32.mxu0 %vm162_vm1, %v3633_v48  ;;  %3330 = vmatprep.mubr.msk.f32.mxu1 %vm162_vm1, %v3636_v49 }
  0x77   : > { %3317 = vmatmul.mubr.msk.f32.gmra.mxu0 %vm162_vm1, %v3643_v50  ;;  %3331 = vmatmul.mubr.msk.f32.gmra.mxu1 %vm162_vm1, %v3646_v51 }
  0x78   : > { %3319 = vmatprep.mubr.msk.f32.mxu0 %vm162_vm1, %v3659_v52  ;;  %3333 = vmatprep.mubr.msk.f32.mxu1 %vm162_vm1, %v3662_v53 }
  0x7b   : > { %3320 = vmatmul.mubr.msk.f32.gmra.mxu0 %vm162_vm1, %v3665_v54  ;;  %3334 = vmatmul.mubr.msk.f32.gmra.mxu1 %vm162_vm1, %v3668_v55 }
  0x7c   : > { %3322 = vmatprep.mubr.msk.f32.mxu0 %vm162_vm1, %v3679_v56  ;;  %3336 = vmatprep.mubr.msk.f32.mxu1 %vm162_vm1, %v3682_v57 }
  0x7f   : > { %3323 = vmatmul.mubr.msk.f32.gmra.mxu0 %vm162_vm1, %v2932_v14  ;;  %3337 = vmatmul.mubr.msk.f32.gmra.mxu1 %vm162_vm1, %v2950_v15 }
  0x80   : > { %3341 = vmatprep.mubr.msk.f32.mxu0 %vm162_vm1, %v3693_v60  ;;  %3355 = vmatprep.mubr.msk.f32.mxu1 %vm162_vm1, %v3696_v61 }
  0x83   : > { %3342 = vmatmul.mubr.msk.f32.vlgmr.msra.gmra.mxu0 %vm162_vm1, %v3699_v62  ;;  %3356 = vmatmul.mubr.msk.f32.vlgmr.msra.gmra.mxu1 %vm162_vm1, %v3702_v63 }
  0x84   : > { %3344 = vmatprep.mubr.msk.f32.mxu0 %vm162_vm1, %v3717_v2  ;;  %3358 = vmatprep.mubr.msk.f32.mxu1 %vm162_vm1, %v3720_v3 }
  0x87   : > { %3345 = vmatmul.mubr.msk.f32.gmra.mxu0 %vm162_vm1, %v3727_v4  ;;  %3359 = vmatmul.mubr.msk.f32.gmra.mxu1 %vm162_vm1, %v3730_v5 }
  0x88   : > { %3347 = vmatprep.mubr.msk.f32.mxu0 %vm162_vm1, %v3743_v10  ;;  %3361 = vmatprep.mubr.msk.f32.mxu1 %vm162_vm1, %v3746_v11 }
  0x8b   : > { %3348 = vmatmul.mubr.msk.f32.gmra.mxu0 %vm162_vm1, %v3749_v22  ;;  %3362 = vmatmul.mubr.msk.f32.gmra.mxu1 %vm162_vm1, %v3752_v23 }
  0x8c   : > { %3350 = vmatprep.mubr.msk.f32.mxu0 %vm162_vm1, %v3763_v28  ;;  %3364 = vmatprep.mubr.msk.f32.mxu1 %vm162_vm1, %v3766_v29 }
  0x8f   : > { %3351 = vmatmul.mubr.msk.f32.gmra.mxu0 %vm162_vm1, %v2968_v16  ;;  %3365 = vmatmul.mubr.msk.f32.gmra.mxu1 %vm162_vm1, %v2986_v17 }
  0xd3   : > { %v3147_v18 = vpop.f32.mrf.mxu0  ;;  %v3161_v19 = vpop.f32.mrf.mxu1 }
  0xd4   : > { %v395_v20 = vadd.f32 %v3161_v19, %v3147_v18 }
  0xd5   : > { %v257_v21 = vpop.f32.mrf.mxu0  ;;  %v389_v24 = vpop.f32.mrf.mxu1 }
  0xd6   : > { %v390_v25 = vadd.f32 %v389_v24, %v257_v21 }
  0xd7   : > { %v3150_v26 = vpop.f32.mrf.mxu0  ;;  %v3164_v27 = vpop.f32.mrf.mxu1 }
  0xd8   : > { %v405_v30 = vadd.f32 %v3164_v27, %v3150_v26 }
  0xd9   : > { %v267_v31 = vpop.f32.mrf.mxu0  ;;  %v399_v32 = vpop.f32.mrf.mxu1 }
  0xda   : > { %v400_v33 = vadd.f32 %v399_v32, %v267_v31 }
  0xdb   : > { %v3153_v34 = vpop.f32.mrf.mxu0  ;;  %v3167_v35 = vpop.f32.mrf.mxu1 }
  0xdc   : > { %v415_v36 = vadd.f32 %v3167_v35, %v3153_v34 }
  0xdd   : > { %v277_v37 = vpop.f32.mrf.mxu0  ;;  %v409_v38 = vpop.f32.mrf.mxu1 }
  0xde   : > { %v410_v39 = vadd.f32 %v409_v38, %v277_v37 }
  0xdf   : > { %v3156_v42 = vpop.f32.mrf.mxu0  ;;  %v3170_v43 = vpop.f32.mrf.mxu1 }
  0xe0   : > { %v425_v44 = vadd.f32 %v3170_v43, %v3156_v42 }
  0xe1   : > { %v287_v45 = vpop.f32.mrf.mxu0  ;;  %v419_v46 = vpop.f32.mrf.mxu1 }
  0xe2   : > { %v420_v47 = vadd.f32 %v419_v46, %v287_v45 }
  0xe3   : > { %v3175_v48 = vpop.f32.mrf.mxu0  ;;  %v3189_v49 = vpop.f32.mrf.mxu1 }
  0xe4   : > { %v571_v50 = vadd.f32 %v3175_v48, %v395_v20 }
  0xe5   : > { %v531_v51 = vpop.f32.mrf.mxu0  ;;  %v681_v52 = vpop.f32.mrf.mxu1 }
  0xe6   : > { %v721_v53 = vadd.f32 %v3189_v49, %v571_v50  ;;  %v570_v54 = vadd.f32 %v531_v51, %v390_v25 }
  0xe7   : > { %v3178_v55 = vpop.f32.mrf.mxu0  ;;  %v3192_v56 = vpop.f32.mrf.mxu1 }
  0xe8   : > { %v3922_v57 = vadd.f32 %v681_v52, %v570_v54  ;;  %v573_v58 = vadd.f32 %v3178_v55, %v405_v30 }
  0xe9   : > { %v541_v59 = vpop.f32.mrf.mxu0  ;;  %v691_v60 = vpop.f32.mrf.mxu1 }
  0xea   : > { %v723_v61 = vadd.f32 %v3192_v56, %v573_v58  ;;  %v572_v62 = vadd.f32 %v541_v59, %v400_v33 }
  0xeb   : > { %v3181_v63 = vpop.f32.mrf.mxu0  ;;  %v3195_v0 = vpop.f32.mrf.mxu1 }
  0xec   : > { %v3924_v1 = vadd.f32 %v691_v60, %v572_v62  ;;  %v575_v2 = vadd.f32 %v3181_v63, %v415_v36 }
  0xed   : > { %v551_v3 = vpop.f32.mrf.mxu0  ;;  %v701_v4 = vpop.f32.mrf.mxu1 }
  0xee   : > { %v725_v5 = vadd.f32 %v3195_v0, %v575_v2  ;;  %v574_v10 = vadd.f32 %v551_v3, %v410_v39 }
  0xef   : > { %v3184_v11 = vpop.f32.mrf.mxu0  ;;  %v3198_v22 = vpop.f32.mrf.mxu1 }
  0xf0   : > { %v3926_v23 = vadd.f32 %v701_v4, %v574_v10  ;;  %v577_v28 = vadd.f32 %v3184_v11, %v425_v44 }
  0xf1   : > { %v561_v29 = vpop.f32.mrf.mxu0  ;;  %v711_v40 = vpop.f32.mrf.mxu1 }
  0xf2   : > { %v727_v41 = vadd.f32 %v3198_v22, %v577_v28  ;;  %v576_v6 = vadd.f32 %v561_v29, %v420_v47 }
  0xf3   : > { %v3203_v7 = vpop.f32.mrf.mxu0  ;;  %v3217_v8 = vpop.f32.mrf.mxu1 }
  0xf4   : > { %v3928_v9 = vadd.f32 %v711_v40, %v576_v6  ;;  %v872_v12 = vadd.f32 %v3203_v7, %v721_v53 }
  0xf5   : > { %v832_v13 = vpop.f32.mrf.mxu0  ;;  %v3930_v14 = vpop.f32.mrf.mxu1 }
  0xf6   : > { %v3932_v15 = vadd.f32 %v3217_v8, %v872_v12  ;;  %v871_v12 = vadd.f32 %v832_v13, %v3922_v57 }
  0xf7   : > { %v3206_v16 = vpop.f32.mrf.mxu0  ;;  %v3220_v17 = vpop.f32.mrf.mxu1 }
  0xf8   : > { %v874_v18 = vadd.f32 %v3206_v16, %v723_v61 }
  0xf9   : > { %v842_v19 = vpop.f32.mrf.mxu0  ;;  %v3934_v20 = vpop.f32.mrf.mxu1 }
  0xfa   : > { %v3936_v21 = vadd.f32 %v3220_v17, %v874_v18 }
  0xfb   : > { %v3209_v24 = vpop.f32.mrf.mxu0  ;;  %v3223_v25 = vpop.f32.mrf.mxu1 }
  0xfc   : > { %v876_v26 = vadd.f32 %v3209_v24, %v725_v5 }
  0xfd   : > { %v852_v27 = vpop.f32.mrf.mxu0  ;;  %v3938_v30 = vpop.f32.mrf.mxu1 }
  0xfe   : > { %v3940_v31 = vadd.f32 %v3223_v25, %v876_v26  ;;  %v1022_v25 = vadd.f32 %v3930_v14, %v871_v12  ;;  %v875_v13 = vadd.f32 %v852_v27, %v3926_v23 }
  0xff   : > { %v3212_v32 = vpop.f32.mrf.mxu0  ;;  %v3226_v33 = vpop.f32.mrf.mxu1 }
 0x100   : > { %v878_v34 = vadd.f32 %v3212_v32, %v727_v41  ;;  %v873_v32 = vadd.f32 %v842_v19, %v3924_v1 }
 0x101   : > { %v3942_v35 = vpop.f32.mrf.mxu0  ;;  %v3944_v36 = vpop.f32.mrf.mxu1 }
 0x102   : > { %v3946_v37 = vadd.f32 %v3226_v33, %v878_v34  ;;  %v1024_v14 = vadd.f32 %v3934_v20, %v873_v32 }
 0x103   : > { %v3231_v38 = vpop.f32.mrf.mxu0  ;;  %v3245_v39 = vpop.f32.mrf.mxu1 }
 0x104   : > { %v1173_v26 = vadd.f32 %v3231_v38, %v3932_v15 }
 0x105   : > { %v1133_v42 = vpop.f32.mrf.mxu0  ;;  %v1283_v43 = vpop.f32.mrf.mxu1 }
 0x107   : > { %v3234_v44 = vpop.f32.mrf.mxu0  ;;  %v3248_v45 = vpop.f32.mrf.mxu1 }
 0x109   : > { %v1143_v46 = vpop.f32.mrf.mxu0  ;;  %v3948_v47 = vpop.f32.mrf.mxu1 }
 0x10a   : > { %v1174_v38 = vadd.f32 %v1143_v46, %v1024_v14 }
 0x10b   : > { %v3237_v48 = vpop.f32.mrf.mxu0  ;;  %v3950_v49 = vpop.f32.mrf.mxu1 }
 0x10d   : > { %v1153_v50 = vpop.f32.mrf.mxu0  ;;  %v3952_v51 = vpop.f32.mrf.mxu1 }
 0x10f   : > { %v3954_v52 = vpop.f32.mrf.mxu0  ;;  %v3956_v53 = vpop.f32.mrf.mxu1 }
 0x111   : > { %v3958_v54 = vpop.f32.mrf.mxu0  ;;  %v3960_v55 = vpop.f32.mrf.mxu1 }
 0x113   : > { %v3259_v56 = vpop.f32.mrf.mxu0  ;;  %v3273_v58 = vpop.f32.mrf.mxu1 }
 0x115   : > { %v1434_v59 = vpop.f32.mrf.mxu0  ;;  %v1585_v60 = vpop.f32.mrf.mxu1 }
 0x117   : > { %v3262_v61 = vpop.f32.mrf.mxu0  ;;  %v3962_v62 = vpop.f32.mrf.mxu1 }
 0x119   : > { %v1444_v63 = vpop.f32.mrf.mxu0  ;;  %v3964_v0 = vpop.f32.mrf.mxu1 }
 0x11b   : > { %v3265_v2 = vpop.f32.mrf.mxu0  ;;  %v3966_v3 = vpop.f32.mrf.mxu1 }
 0x11d   : > { %v3968_v4 = vpop.f32.mrf.mxu0  ;;  %v3970_v5 = vpop.f32.mrf.mxu1 }
 0x11f   : > { %v3972_v10 = vpop.f32.mrf.mxu0  ;;  %v3974_v11 = vpop.f32.mrf.mxu1 }
 0x120   : > { %4107 = vst [vmem:[#allocation2_spill] sm:$0xff] %v3974_v11 }
 0x121   : > { %v3976_v22 = vpop.f32.mrf.mxu0  ;;  %v3978_v28 = vpop.f32.mrf.mxu1 }
 0x122   : > { %4108 = vst [vmem:[#allocation3_spill] sm:$0xff] %v3978_v28  ;;  %v1172_v28 = vadd.f32 %v1133_v42, %v1022_v25  ;;  %v1177_v42 = vadd.f32 %v3237_v48, %v3940_v31 }
 0x123   : > { %v3287_v29 = vpop.f32.mrf.mxu0  ;;  %v3301_v40 = vpop.f32.mrf.mxu1 }
 0x124   : > { %v1322_v1 = vadd.f32 %v1283_v43, %v1172_v28  ;;  %v1324_v43 = vadd.f32 %v3948_v47, %v1174_v38  ;;  %v1327_v46 = vadd.f32 %v3950_v49, %v1177_v42 }
 0x125   : > { %v1735_v41 = vpop.f32.mrf.mxu0  ;;  %v3980_v6 = vpop.f32.mrf.mxu1 }
 0x126   : > { %v1473_v23 = vadd.f32 %v1434_v59, %v1322_v1  ;;  %v1475_v59 = vadd.f32 %v1444_v63, %v1324_v43 }
 0x127   : > { %v3290_v7 = vpop.f32.mrf.mxu0  ;;  %v3982_v8 = vpop.f32.mrf.mxu1 }
 0x128   : > { %v1624_v48 = vadd.f32 %v1585_v60, %v1473_v23 }
 0x129   : > { %v3985_v16 = vpop.f32.mrf.mxu0  ;;  %v3987_v17 = vpop.f32.mrf.mxu1 }
 0x12a   : > { %4109 = vst [vmem:[#allocation4_spill] sm:$0xff] %v3987_v17  ;;  %v1323_v17 = vadd.f32 %v3245_v39, %v1173_v26  ;;  %v1774_v47 = vadd.f32 %v1735_v41, %v1624_v48 }
 0x12b   : > { %v3293_v18 = vpop.f32.mrf.mxu0  ;;  %v3989_v24 = vpop.f32.mrf.mxu1 }
 0x12c   : > { %4110 = vst [vmem:[#allocation5_spill] sm:$0xff] %v3989_v24  ;;  %v1175_v24 = vadd.f32 %v3234_v44, %v3936_v21  ;;  %v1474_v19 = vadd.f32 %v3259_v56, %v1323_v17  ;;  %v877_v21 = vadd.f32 %v3942_v35, %v3928_v9  ;;  %v1478_v9 = vadd.f32 %v3265_v2, %v1327_v46 }
 0x12d   : > { %v3994_v33 = vpop.f32.mrf.mxu0  ;;  %v3996_v34 = vpop.f32.mrf.mxu1 }
 0x12e   : > { %4111 = vst [vmem:[#allocation6_spill] sm:$0xff] %v3996_v34  ;;  %v1625_v44 = vadd.f32 %v3273_v58, %v1474_v19 }
 0x12f   : > { %v3998_v11 = vpop.f32.mrf.mxu0  ;;  %v4000_v57 = vpop.f32.mrf.mxu1 }
 0x130   : > { %4112 = vst [vmem:[#allocation7_spill] sm:$0xff] %v3998_v11  ;;  %4113 = vst [vmem:[#allocation8_spill] sm:$0xff] %v4000_v57  ;;  %v1026_v57 = vadd.f32 %v3938_v30, %v875_v13  ;;  %v1325_v11 = vadd.f32 %v3248_v45, %v1175_v24  ;;  %v1775_v28 = vadd.f32 %v3287_v29, %v1625_v44 }
 0x131   : > { %v4005_v12 = vpop.f32.mrf.mxu0  ;;  %v4007_v15 = vpop.f32.mrf.mxu1  ;;  %v1028_v30 = vadd.f32 %v3944_v36, %v877_v21  ;;  %v1179_v45 = vadd.f32 %v3954_v52, %v3946_v37  ;;  %v1626_v37 = vadd.f32 %v3964_v0, %v1475_v59  ;;  %v1629_v52 = vadd.f32 %v3966_v3, %v1478_v9  ;;  %v4117_v21 = vld [vmem:[#allocation3_spill] sm:$0xff] }
 0x132   : > { %v1176_v39 = vadd.f32 %v1153_v50, %v1026_v57  ;;  %v1476_v26 = vadd.f32 %v3262_v61, %v1325_v11  ;;  %v1925_v29 = vadd.f32 %v3301_v40, %v1775_v28 }
 0x133   : > { %v3315_v25 = vpop.f32.mrf.mxu0  ;;  %v3329_v34 = vpop.f32.mrf.mxu1  ;;  %v1178_v49 = vadd.f32 %v3958_v54, %v1028_v30  ;;  %v1329_v24 = vadd.f32 %v3956_v53, %v1179_v45  ;;  %v1776_v32 = vadd.f32 %v3985_v16, %v1626_v37  ;;  %v4115_v16 = vld [vmem:[#allocation4_spill] sm:$0xff]  ;;  %v4116_v38 = vld [vmem:[#allocation5_spill] sm:$0xff] }
 0x134   : > { %v1326_v50 = vadd.f32 %v3952_v51, %v1176_v39  ;;  %v1627_v58 = vadd.f32 %v3962_v62, %v1476_v26  ;;  %v1924_v51 = vadd.f32 %v3980_v6, %v1774_v47  ;;  %v2076_v62 = vadd.f32 %v3315_v25, %v1925_v29 }
 0x135   : > { %v2036_v27 = vpop.f32.mrf.mxu0  ;;  %v2187_v20 = vpop.f32.mrf.mxu1  ;;  %v1328_v41 = vadd.f32 %v3960_v55, %v1178_v49  ;;  %v1480_v54 = vadd.f32 %v3972_v10, %v1329_v24  ;;  %v4114_v10 = vld [vmem:[#allocation2_spill] sm:$0xff] }
 0x136   : > { %v1477_v60 = vadd.f32 %v3968_v4, %v1326_v50  ;;  %v1777_v36 = vadd.f32 %v3290_v7, %v1627_v58  ;;  %v1779_v4 = vadd.f32 %v3293_v18, %v1629_v52  ;;  %v2075_v57 = vadd.f32 %v2036_v27, %v1924_v51 }
 0x137   : > { %v3318_v56 = vpop.f32.mrf.mxu0  ;;  %v3332_v31 = vpop.f32.mrf.mxu1  ;;  %v1479_v3 = vadd.f32 %v3976_v22, %v1328_v41  ;;  %v2227_v55 = vadd.f32 %v3329_v34, %v2076_v62  ;;  %v1631_v19 = vadd.f32 %v4114_v10, %v1480_v54  ;;  %v1926_v18 = vadd.f32 %v4115_v16, %v1776_v32  ;;  %v4118_v22 = vld [vmem:[#allocation7_spill] sm:$0xff]  ;;  %v4119_v34 = vld [vmem:[#allocation6_spill] sm:$0xff]  ;;  %v4120_v58 = vld [vmem:[#allocation8_spill] sm:$0xff] }
 0x138   : > { %v1628_v53 = vadd.f32 %v3970_v5, %v1477_v60  ;;  %v1927_v0 = vadd.f32 %v3982_v8, %v1777_v36  ;;  %v1929_v42 = vadd.f32 %v4116_v38, %v1779_v4  ;;  %v2226_v23 = vadd.f32 %v2187_v20, %v2075_v57 }
 0x139   : > { %v2046_v35 = vpop.f32.mrf.mxu0  ;;  %v2197_v17 = vpop.f32.mrf.mxu1  ;;  %v1630_v27 = vadd.f32 %v4117_v21, %v1479_v3  ;;  %v1781_v39 = vadd.f32 %v4118_v22, %v1631_v19 }
 0x13a   : > { %v1778_v6 = vadd.f32 %v3994_v33, %v1628_v53  ;;  %v2078_v1 = vadd.f32 %v3318_v56, %v1927_v0  ;;  %v2077_v44 = vadd.f32 %v2046_v35, %v1926_v18 }
 0x13b   : > { %v3321_v61 = vpop.f32.mrf.mxu0  ;;  %v3335_v11 = vpop.f32.mrf.mxu1  ;;  %v1780_v30 = vadd.f32 %v4005_v12, %v1630_v27  ;;  %v1931_v47 = vadd.f32 %v4120_v58, %v1781_v39 }
 0x13c   : > { %v2080_v26 = vadd.f32 %v3321_v61, %v1929_v42  ;;  %v1928_v46 = vadd.f32 %v4119_v34, %v1778_v6  ;;  %v2229_v56 = vadd.f32 %v3332_v31, %v2078_v1  ;;  %v2228_v49 = vadd.f32 %v2197_v17, %v2077_v44 }
 0x13d   : > { %v2056_v63 = vpop.f32.mrf.mxu0  ;;  %v2207_v2 = vpop.f32.mrf.mxu1  ;;  %v1930_v37 = vadd.f32 %v4007_v15, %v1780_v30 }
 0x13e   : > { %v2079_v59 = vadd.f32 %v2056_v63, %v1928_v46  ;;  %v2231_v61 = vadd.f32 %v3335_v11, %v2080_v26 }
 0x13f   : > { %v3324_v40 = vpop.f32.mrf.mxu0  ;;  %v3338_v7 = vpop.f32.mrf.mxu1 }
 0x140   : > { %v2082_v52 = vadd.f32 %v3324_v40, %v1931_v47  ;;  %v2230_v62 = vadd.f32 %v2207_v2, %v2079_v59 }
 0x141   : > { %v2066_v13 = vpop.f32.mrf.mxu0  ;;  %v4032_v14 = vpop.f32.mrf.mxu1 }
 0x142   : > { %v2081_v4 = vadd.f32 %v2066_v13, %v1930_v37  ;;  %v2233_v6 = vadd.f32 %v3338_v7, %v2082_v52 }
 0x143   : > { %v3343_v25 = vpop.f32.mrf.mxu0  ;;  %v3357_v5 = vpop.f32.mrf.mxu1 }
 0x144   : > { %v2377_v8 = vadd.f32 %v3343_v25, %v2227_v55  ;;  %v2232_v18 = vadd.f32 %v4032_v14, %v2081_v4 }
 0x145   : > { %v2337_v43 = vpop.f32.mrf.mxu0  ;;  %v2487_v33 = vpop.f32.mrf.mxu1 }
 0x146   : > { %v4041_v48 = vadd.f32 %v3357_v5, %v2377_v8  ;;  %v2376_v28 = vadd.f32 %v2337_v43, %v2226_v23 }
 0x147   : > { %v3346_v45 = vpop.f32.mrf.mxu0  ;;  %v3360_v20 = vpop.f32.mrf.mxu1 }
 0x148   : > { %v2557_v9 = vmul.f32 %v4041_v48, %v4041_v48  ;;  %v4046_v50 = vadd.f32 %v2487_v33, %v2376_v28  ;;  %v2379_v35 = vadd.f32 %v3346_v45, %v2229_v56  ;;  %v2536_v29 = vsel %vm2534_vm2, %v4041_v48, 0.0 }
 0x149   : > { %v2347_v31 = vpop.f32.mrf.mxu0  ;;  %v2497_v60 = vpop.f32.mrf.mxu1 }
 0x14a   : > { %v2535_v12 = vsel %vm2534_vm2, %v4046_v50, 0.0  ;;  %v2556_v36 = vmul.f32 %v4046_v50, %v4046_v50  ;;  %v4055_v24 = vadd.f32 %v3360_v20, %v2379_v35  ;;  %v2378_v51 = vadd.f32 %v2347_v31, %v2228_v49 }
 0x14b   : > { %v2537_v63 = vadd.f32 %v2536_v29, %v2535_v12  ;;  %v3349_v17 = vpop.f32.mrf.mxu0  ;;  %v3363_v11 = vpop.f32.mrf.mxu1  ;;  %v2565_v41 = vsel %vm2534_vm2, %v2557_v9, 0.0 }
 0x14c   : > { %v2564_v54 = vsel %vm2534_vm2, %v2556_v36, 0.0  ;;  %v2381_v32 = vadd.f32 %v3349_v17, %v2231_v61  ;;  %v4060_v0 = vadd.f32 %v2497_v60, %v2378_v51  ;;  %v2559_v15 = vmul.f32 %v4055_v24, %v4055_v24 }
 0x14d   : > { %v2566_v53 = vadd.f32 %v2565_v41, %v2564_v54  ;;  %v2357_v57 = vpop.f32.mrf.mxu0  ;;  %v2507_v3 = vpop.f32.mrf.mxu1  ;;  %v2540_v38 = vsel %vm2534_vm2, %v4055_v24, 0.0 }
 0x14e   : > { %v2380_v40 = vadd.f32 %v2357_v57, %v2230_v62  ;;  %v2538_v55 = vsel %vm2534_vm2, %v4060_v0, 0.0  ;;  %v2558_v2 = vmul.f32 %v4060_v0, %v4060_v0  ;;  %v4068_v1 = vadd.f32 %v3363_v11, %v2381_v32 }
 0x14f   : > { %v3352_v10 = vpop.f32.mrf.mxu0  ;;  %v2539_v13 = vadd.f32 %v2538_v55, %v2537_v63  ;;  %v3366_v16 = vpop.f32.mrf.mxu1  ;;  %v2569_v5 = vsel %vm2534_vm2, %v2559_v15, 0.0 }
 0x150   : > { %v4070_v19 = vadd.f32 %v2507_v3, %v2380_v40  ;;  %v2567_v7 = vsel %vm2534_vm2, %v2558_v2, 0.0  ;;  %v2383_v42 = vadd.f32 %v3352_v10, %v2233_v6  ;;  %v2561_v27 = vmul.f32 %v4068_v1, %v4068_v1 }
 0x151   : > { %v2367_v25 = vpop.f32.mrf.mxu0  ;;  %v2568_v23 = vadd.f32 %v2567_v7, %v2566_v53  ;;  %v2541_v8 = vadd.f32 %v2540_v38, %v2539_v13  ;;  %v2517_v43 = vpop.f32.mrf.mxu1  ;;  %v2544_v33 = vsel %vm2534_vm2, %v4068_v1, 0.0 }
 0x152   : > { %v2542_v21 = vsel %vm2534_vm2, %v4070_v19, 0.0  ;;  %v2560_v14 = vmul.f32 %v4070_v19, %v4070_v19  ;;  %v2533_v22 = vadd.f32 %v3366_v16, %v2383_v42  ;;  %v2382_v39 = vadd.f32 %v2367_v25, %v2232_v18 }
 0x153   : > { %v2543_v44 = vadd.f32 %v2542_v21, %v2541_v8  ;;  %v2570_v26 = vadd.f32 %v2569_v5, %v2568_v23  ;;  %v2573_v30 = vsel %vm2534_vm2, %v2561_v27, 0.0 }
 0x154   : > { %v2571_v34 = vsel %vm2534_vm2, %v2560_v14, 0.0  ;;  %v2532_v46 = vadd.f32 %v2517_v43, %v2382_v39  ;;  %v2563_v45 = vmul.f32 %v2533_v22, %v2533_v22  ;;  %v2548_v58 = vsel %vm2534_vm2, %v2533_v22, 0.0 }
 0x155   : > { %v2572_v56 = vadd.f32 %v2571_v34, %v2570_v26  ;;  %v2545_v28 = vadd.f32 %v2544_v33, %v2543_v44 }
 0x156   : > { %v2546_v20 = vsel %vm2534_vm2, %v2532_v46, 0.0  ;;  %v2562_v59 = vmul.f32 %v2532_v46, %v2532_v46  ;;  %v2577_v31 = vsel %vm2534_vm2, %v2563_v45, 0.0 }
 0x157   : > { %v2547_v9 = vadd.f32 %v2546_v20, %v2545_v28  ;;  %v2574_v35 = vadd.f32 %v2573_v30, %v2572_v56 }
 0x158   : > { %v2575_v47 = vsel %vm2534_vm2, %v2562_v59, 0.0 }
 0x159   : > { %v2549_v49 = vadd.f32 %v2548_v58, %v2547_v9  ;;  %v2576_v61 = vadd.f32 %v2575_v47, %v2574_v35 }
 0x15b   : > { %v2550_v60 = vrot.slane %v2549_v49, 4  ;;  %v2578_v29 = vadd.f32 %v2577_v31, %v2576_v61 }
 0x15d   : > { %v2551_v12 = vadd.f32 %v2550_v60, %v2549_v49  ;;  %v2579_v36 = vrot.slane %v2578_v29, 4 }
 0x15f   : > { %v2552_v37 = vrot.slane %v2551_v12, 2  ;;  %v2580_v52 = vadd.f32 %v2579_v36, %v2578_v29 }
 0x161   : > { %v2553_v63 = vadd.f32 %v2552_v37, %v2551_v12  ;;  %v2581_v51 = vrot.slane %v2580_v52, 2 }
 0x163   : > { %v2554_v17 = vrot.slane %v2553_v63, 1  ;;  %v2582_v11 = vadd.f32 %v2581_v51, %v2580_v52 }
 0x165   : > { %v2555_v62 = vadd.f32 %v2554_v17, %v2553_v63  ;;  %v2583_v41 = vrot.slane %v2582_v11, 1 }
 0x167   : > { %v2584_v54 = vadd.f32 %v2583_v41, %v2582_v11  ;;  %v2585_v32 = vmul.f32 0.015625, %v2555_v62 }
 0x169   : > { %v2586_v4 = vmul.f32 0.015625, %v2584_v54  ;;  %v2587_v53 = vmul.f32 %v2585_v32, %v2585_v32  ;;  %v2596_v57 = vsub.f32 %v2532_v46, %v2585_v32  ;;  %v2590_v3 = vsub.f32 %v4046_v50, %v2585_v32 }
 0x16a   : > { %v2591_v15 = vsub.f32 %v4041_v48, %v2585_v32  ;;  %v2592_v40 = vsub.f32 %v4060_v0, %v2585_v32  ;;  %v2593_v6 = vsub.f32 %v4055_v24, %v2585_v32  ;;  %v2594_v55 = vsub.f32 %v4070_v19, %v2585_v32 }
 0x16b   : > { %v2588_v2 = vsub.f32 %v2586_v4, %v2587_v53  ;;  %v2595_v10 = vsub.f32 %v4068_v1, %v2585_v32  ;;  %v2597_v13 = vsub.f32 %v2533_v22, %v2585_v32 }
 0x16d   : > { %v2589_v16 = vmax.f32 %v2588_v2, 0.0 }
 0x16f   : > { %v2598_v18 = vadd.f32 1e-05, %v2589_v16 }
 0x171   : > { %3377 = vrsqrt.f32 %v2598_v18 }
 0x17e   : > { %v3378_v38 = vpop.eup %3377 }
 0x17f   : > { %v2600_v7 = vmul.f32 %v3378_v38, %v2590_v3  ;;  %v2601_v42 = vmul.f32 %v3378_v38, %v2591_v15  ;;  %v2602_v25 = vmul.f32 %v3378_v38, %v2592_v40  ;;  %v2603_v50 = vmul.f32 %v3378_v38, %v2593_v6 }
 0x180   : > { %v2604_v5 = vmul.f32 %v3378_v38, %v2594_v55  ;;  %v2605_v48 = vmul.f32 %v3378_v38, %v2595_v10  ;;  %v2606_v23 = vmul.f32 %v3378_v38, %v2596_v57  ;;  %v2607_v0 = vmul.f32 %v3378_v38, %v2597_v13 }
 0x181   : > { %vm2608_vm3 = vcmp.ge.f32.partialorder %v2600_v7, 0.0  ;;  %v2616_v24 = vmul.f32 0.2, %v2600_v7  ;;  %v2617_v19 = vmul.f32 0.2, %v2601_v42  ;;  %vm2609_vm4 = vcmp.ge.f32.partialorder %v2601_v42, 0.0 }
 0x182   : > { %v2618_v21 = vmul.f32 0.2, %v2602_v25  ;;  %vm2610_vm5 = vcmp.ge.f32.partialorder %v2602_v25, 0.0  ;;  %v2619_v14 = vmul.f32 0.2, %v2603_v50  ;;  %vm2611_vm6 = vcmp.ge.f32.partialorder %v2603_v50, 0.0 }
 0x183   : > { %v2624_v8 = vsel %vm2608_vm3, %v2600_v7, %v2616_v24  ;;  %v2625_v1 = vsel %vm2609_vm4, %v2601_v42, %v2617_v19  ;;  %v2620_v39 = vmul.f32 0.2, %v2604_v5  ;;  %vm2612_vm7 = vcmp.ge.f32.partialorder %v2604_v5, 0.0 }
 0x184   : > { %2632 = vxpose.xlu0.b32.start [1/8] (short) (narrow) %v2624_v8, 8  ;;  %v2626_v27 = vsel %vm2610_vm5, %v2602_v25, %v2618_v21  ;;  %v2627_v22 = vsel %vm2611_vm6, %v2603_v50, %v2619_v14  ;;  %v2621_v26 = vmul.f32 0.2, %v2605_v48  ;;  %vm2613_vm8 = vcmp.ge.f32.partialorder %v2605_v48, 0.0 }
 0x185   : > { %v2628_v44 = vsel %vm2612_vm7, %v2604_v5, %v2620_v39  ;;  %v2622_v33 = vmul.f32 0.2, %v2606_v23  ;;  %vm2614_vm9 = vcmp.ge.f32.partialorder %v2606_v23, 0.0  ;;  %v2623_v46 = vmul.f32 0.2, %v2607_v0 }
 0x186   : > { %v2629_v43 = vsel %vm2613_vm8, %v2605_v48, %v2621_v26  ;;  %vm2615_vm10 = vcmp.ge.f32.partialorder %v2607_v0, 0.0 }
 0x187   : > { %v2630_v34 = vsel %vm2614_vm9, %v2606_v23, %v2622_v33  ;;  %v2631_v56 = vsel %vm2615_vm10, %v2607_v0, %v2623_v46 }
 0x188   : > { %2633 = vxpose.xlu0.b32.cont [2/8] (short) (narrow) %v2625_v1, 8 }
 0x18c   : > { %2634 = vxpose.xlu0.b32.cont [3/8] (short) (narrow) %v2626_v27, 8 }
 0x190   : > { %2635 = vxpose.xlu0.b32.cont [4/8] (short) (narrow) %v2627_v22, 8 }
 0x194   : > { %2636 = vxpose.xlu0.b32.cont [5/8] (short) (narrow) %v2628_v44, 8 }
 0x198   : > { %2637 = vxpose.xlu0.b32.cont [6/8] (short) (narrow) %v2629_v43, 8 }
 0x19c   : > { %2638 = vxpose.xlu0.b32.cont [7/8] (short) (narrow) %v2630_v34, 8 }
 0x1a0   : > { %2639 = vxpose.xlu0.b32.end [8/8] (short) (narrow) %v2631_v56, 8 }
 0x200   : > { %v2648_v28 = vpop.trf.xlu0 }
 0x201   : > { %2665 = vst.msk [vmem:[%s141_s24] sm:$0xff] %vm2664_vm11, %v2648_v28 }
 0x202 PF: > { %s12_s9 = sadd.s32 1, %s3385_s9  }
 0x203   : > { %p9_p4 = scmp.ge.s32.totalorder %s12_s9, 4  }
 0x205   :  { %11 = sbr.rel (!%p9_p4) target bundleno = 1 (0x1), region = 80 }

</bundles_post_ra>
